<compile_context>
chip_gen: v5e
topology: v5e:2x2
jax: 0.10.0
libtpu: 0.0.40
codegen_flags: <defaults>
</compile_context>

<pallas_src>
import math

import jax
import jax.numpy as jnp
from jax.experimental import pallas as pl
from jax.experimental.pallas import tpu as pltpu


# -----------------------------------------------------------------------------
# Pallas kernel: whole forward pass (both LSTMs + deferred output Linear).
# hs_ref is VMEM scratch that collects decoder hidden states in BATCH-MAJOR order.
# -----------------------------------------------------------------------------
def _autoenc_kernel(x_ref, wih_e_ref, whh_e_ref, b_e_ref, pe_ref,
                    wih_d_ref, whh_d_ref, b_d_ref, wfc_ref, bfc_ref,
                    out_ref, hs_ref):
    S = pe_ref.shape[0]
    BS = x_ref.shape[0]
    B = BS // S
    H = whh_e_ref.shape[0]
    G = whh_e_ref.shape[1]           # 4*H

    # ---- hoisted input projections (biases folded in, off the recurrent chain) ----
    # encoder: one [B*S, D] x [D, 4H] matmul; rows stay batch-major (row = b*S + t)
    xg = (jnp.dot(x_ref[...], wih_e_ref[...], preferred_element_type=jnp.float32)
          + b_e_ref[...])                                    # [B*S, 4H]
    xg3 = xg.reshape(B, S, G)                                # layout no-op relabel

    # decoder: pe rows are identical for all batch elements -> [S, H] x [H, 4H] once,
    # then ONE broadcast over batch (kept out of the unrolled recurrent chain).
    pg = (jnp.dot(pe_ref[...], wih_d_ref[...], preferred_element_type=jnp.float32)
          + b_d_ref[...])                                    # [S, 4H]
    pg3 = jnp.broadcast_to(pg[None, :, :], (B, S, G))        # [B, S, 4H]

    whh_e = whh_e_ref[...]
    whh_d = whh_d_ref[...]

    def cell(pre_gates, h, c, whh):
        # pre_gates already holds x @ W_ih + b; only the recurrent dot remains.
        gates = pre_gates + jnp.dot(h, whh, preferred_element_type=jnp.float32)
        # 4H == 128 lanes at H=32: two full-vreg EUP ops instead of four sliced ones
        # (re-evaluate once B >= 8; at B=2 op-issue overhead dominates element count).
        sg = jax.nn.sigmoid(gates)
        th = jnp.tanh(gates)
        i = sg[:, 0 * H:1 * H]
        f = sg[:, 1 * H:2 * H]
        g = th[:, 2 * H:3 * H]
        o = sg[:, 3 * H:4 * H]
        c = f * c + i * g
        h = o * jnp.tanh(c)
        return h, c

    h = jnp.zeros((B, H), jnp.float32)
    c = jnp.zeros((B, H), jnp.float32)

    # ---- encoder LSTM: statically unrolled; per-step input slice is batch-major
    # and independent of the recurrence, so it schedules off the serial chain ----
    for t in range(S):
        h, c = cell(xg3[:, t, :], h, c, whh_e)

    # ---- decoder LSTM: init hidden = encoder final h, init cell = zeros ----
    c = jnp.zeros((B, H), jnp.float32)
    for t in range(S):
        h, c = cell(pg3[:, t, :], h, c, whh_d)
        # scatter batch-major (row b*S + t): the output leaves the kernel already in
        # [B*S, ...] order so the wrapper needs only a free reshape, no transpose.
        for b in range(B):
            hs_ref[pl.ds(b * S + t, 1), :] = h[b:b + 1, :]

    # ---- deferred output Linear: one [B*S, H] x [H, O] matmul + single bulk store ----
    out_ref[...] = (jnp.dot(hs_ref[...], wfc_ref[...],
                            preferred_element_type=jnp.float32)
                    + bfc_ref[...])


# -----------------------------------------------------------------------------
# Glue: positional-encoding table, parameter init/prep, wrapper, pure-JAX reference.
# -----------------------------------------------------------------------------
def make_positional_encoding(seq_len, d_model):
    pos = jnp.arange(seq_len, dtype=jnp.float32)[:, None]
    div = jnp.exp(jnp.arange(0, d_model, 2, dtype=jnp.float32)
                  * (-math.log(10000.0) / d_model))
    pe = jnp.zeros((seq_len, d_model), jnp.float32)
    pe = pe.at[:, 0::2].set(jnp.sin(pos * div))
    pe = pe.at[:, 1::2].set(jnp.cos(pos * div))
    return pe[:, None, :]  # [S, 1, H]


def init_params(key, input_dim, hidden_dim, output_dim):
    k = 1.0 / math.sqrt(hidden_dim)
    keys = jax.random.split(key, 10)
    u = lambda kk, shape: jax.random.uniform(kk, shape, jnp.float32, -k, k)
    return dict(
        w_ih_e=u(keys[0], (4 * hidden_dim, input_dim)),
        w_hh_e=u(keys[1], (4 * hidden_dim, hidden_dim)),
        b_ih_e=u(keys[2], (4 * hidden_dim,)),
        b_hh_e=u(keys[3], (4 * hidden_dim,)),
        w_ih_d=u(keys[4], (4 * hidden_dim, hidden_dim)),
        w_hh_d=u(keys[5], (4 * hidden_dim, hidden_dim)),
        b_ih_d=u(keys[6], (4 * hidden_dim,)),
        b_hh_d=u(keys[7], (4 * hidden_dim,)),
        w_fc=u(keys[8], (output_dim, hidden_dim)),
        b_fc=u(keys[9], (output_dim,)),
    )


def prepare_params(params, seq_len):
    """One-time weight layout prep (off the per-call forward path)."""
    H = params["w_hh_e"].shape[1]
    return dict(
        wih_e=params["w_ih_e"].T, whh_e=params["w_hh_e"].T,
        b_e=(params["b_ih_e"] + params["b_hh_e"])[None, :],
        pe=make_positional_encoding(seq_len, H)[:, 0, :],       # [S, H]
        wih_d=params["w_ih_d"].T, whh_d=params["w_hh_d"].T,
        b_d=(params["b_ih_d"] + params["b_hh_d"])[None, :],
        wfc=params["w_fc"].T, bfc=params["b_fc"][None, :],
    )


def positional_autoencoder_forward(x, prep):
    """x: [B, S, input_dim] (batch_first, same as the PyTorch module)."""
    B, S, D = x.shape
    H = prep["whh_e"].shape[0]
    O = prep["wfc"].shape[1]

    # Free (contiguous) reshape -- no XLA transpose op on the forward path.
    x_flat = x.reshape(B * S, D).astype(jnp.float32)

    inputs = (
        x_flat,
        prep["wih_e"], prep["whh_e"], prep["b_e"],
        prep["pe"],
        prep["wih_d"], prep["whh_d"], prep["b_d"],
        prep["wfc"], prep["bfc"],
    )

    def full_spec(a):
        nd = a.ndim
        return pl.BlockSpec(a.shape, lambda i, nd=nd: (0,) * nd)

    # Everything stays VMEM-resident (a few KB total) -> single grid step.
    # At larger batch, add a leading 'parallel' batch grid axis (2 TCs on v7x).
    grid_spec = pltpu.PrefetchScalarGridSpec(
        num_scalar_prefetch=0,
        grid=(1,),
        in_specs=[full_spec(a) for a in inputs],
        out_specs=pl.BlockSpec((B * S, O), lambda i: (0, 0)),
        scratch_shapes=[pltpu.VMEM((B * S, H), jnp.float32)],   # decoder hidden states
    )

    out_flat = pl.pallas_call(
        _autoenc_kernel,
        out_shape=jax.ShapeDtypeStruct((B * S, O), jnp.float32),
        grid_spec=grid_spec,
        compiler_params=pltpu.CompilerParams(dimension_semantics=("arbitrary",)),
    )(*inputs)
    # Kernel output is already batch-major -> free reshape only.
    return out_flat.reshape(B, S, O)


# -------------------------- pure-JAX reference --------------------------------
def _lstm_ref(xs, h0, c0, w_ih, w_hh, b_ih, b_hh):
    def step(carry, x_t):
        h, c = carry
        gates = x_t @ w_ih.T + b_ih + h @ w_hh.T + b_hh
        i, f, g, o = jnp.split(gates, 4, axis=-1)
        c = jax.nn.sigmoid(f) * c + jax.nn.sigmoid(i) * jnp.tanh(g)
        h = jax.nn.sigmoid(o) * jnp.tanh(c)
        return (h, c), h
    (h, c), hs = jax.lax.scan(step, (h0, c0), xs)
    return hs, h


def reference_forward(x, params):
    B, S, _ = x.shape
    H = params["w_hh_e"].shape[1]
    xs = jnp.transpose(x, (1, 0, 2))
    z = jnp.zeros((B, H), jnp.float32)
    _, h_enc = _lstm_ref(xs, z, z, params["w_ih_e"], params["w_hh_e"],
                         params["b_ih_e"], params["b_hh_e"])
    pe = jnp.broadcast_to(make_positional_encoding(S, H), (S, B, H))
    hs_dec, _ = _lstm_ref(pe, h_enc, z, params["w_ih_d"], params["w_hh_d"],
                          params["b_ih_d"], params["b_hh_d"])
    out = hs_dec @ params["w_fc"].T + params["b_fc"]
    return jnp.transpose(out, (1, 0, 2))


if __name__ == "__main__":
    key = jax.random.PRNGKey(0)
    kx, kp = jax.random.split(key)

    B, S, D, H, O = 2, 8, 16, 32, 16          # batch, seq, input, hidden, output
    x = jax.random.normal(kx, (B, S, D), jnp.float32)
    params = init_params(kp, D, H, O)
    prep = prepare_params(params, S)          # one-time layout prep

    out = positional_autoencoder_forward(x, prep)
    out = jax.block_until_ready(out)

    ref = reference_forward(x, params)
    assert out.shape == (B, S, O), out.shape
    assert jnp.allclose(out, ref, atol=1e-4, rtol=1e-4), \
        f"max abs err {jnp.max(jnp.abs(out - ref))}"
    print("KERNEL_OK")
</pallas_src>

<mosaic_0001>
module attributes {stable_mosaic.version = 11 : i64} {
  func.func @_autoenc_kernel(%arg0: i32, %arg1: memref<16x16xf32, #tpu.memory_space<vmem>>, %arg2: memref<16x128xf32, #tpu.memory_space<vmem>>, %arg3: memref<32x128xf32, #tpu.memory_space<vmem>>, %arg4: memref<1x128xf32, #tpu.memory_space<vmem>>, %arg5: memref<8x32xf32, #tpu.memory_space<vmem>>, %arg6: memref<32x128xf32, #tpu.memory_space<vmem>>, %arg7: memref<32x128xf32, #tpu.memory_space<vmem>>, %arg8: memref<1x128xf32, #tpu.memory_space<vmem>>, %arg9: memref<32x16xf32, #tpu.memory_space<vmem>>, %arg10: memref<1x16xf32, #tpu.memory_space<vmem>>, %arg11: memref<16x16xf32, #tpu.memory_space<vmem>>, %arg12: memref<16x32xf32, #tpu.memory_space<vmem>>) attributes {dimension_semantics = [#tpu.dimension_semantics<arbitrary>], iteration_bounds = array<i64: 1>, scalar_prefetch = 0 : i64, scratch_operands = 1 : i64, tpu.core_type = #tpu.core_type<tc>, window_params = [{pipeline_mode = #tpu.pipeline_mode<synchronous>, transform_indices = @transform_0, window_bounds = array<i64: 16, 16>}, {pipeline_mode = #tpu.pipeline_mode<synchronous>, transform_indices = @transform_1, window_bounds = array<i64: 16, 128>}, {pipeline_mode = #tpu.pipeline_mode<synchronous>, transform_indices = @transform_2, window_bounds = array<i64: 32, 128>}, {pipeline_mode = #tpu.pipeline_mode<synchronous>, transform_indices = @transform_3, window_bounds = array<i64: 1, 128>}, {pipeline_mode = #tpu.pipeline_mode<synchronous>, transform_indices = @transform_4, window_bounds = array<i64: 8, 32>}, {pipeline_mode = #tpu.pipeline_mode<synchronous>, transform_indices = @transform_5, window_bounds = array<i64: 32, 128>}, {pipeline_mode = #tpu.pipeline_mode<synchronous>, transform_indices = @transform_6, window_bounds = array<i64: 32, 128>}, {pipeline_mode = #tpu.pipeline_mode<synchronous>, transform_indices = @transform_7, window_bounds = array<i64: 1, 128>}, {pipeline_mode = #tpu.pipeline_mode<synchronous>, transform_indices = @transform_8, window_bounds = array<i64: 32, 16>}, {pipeline_mode = #tpu.pipeline_mode<synchronous>, transform_indices = @transform_9, window_bounds = array<i64: 1, 16>}, {pipeline_mode = #tpu.pipeline_mode<synchronous>, transform_indices = @transform_10, window_bounds = array<i64: 16, 16>}]} {
    %c0 = arith.constant 0 : index
    %c0_0 = arith.constant 0 : index
    %0 = vector.load %arg1[%c0, %c0_0] : memref<16x16xf32, #tpu.memory_space<vmem>>, vector<16x16xf32>
    %c0_1 = arith.constant 0 : index
    %c0_2 = arith.constant 0 : index
    %1 = vector.load %arg2[%c0_1, %c0_2] : memref<16x128xf32, #tpu.memory_space<vmem>>, vector<16x128xf32>
    %cst = arith.constant dense<0.000000e+00> : vector<16x128xf32>
    %2 = tpu.matmul %0, %1, %cst {dimension_numbers = #tpu.dot_dimension_numbers<[1], [0], [0], [1], [0, 0, 1, 1], [], []>} : vector<16x16xf32>, vector<16x128xf32>, vector<16x128xf32> -> vector<16x128xf32>
    %c0_3 = arith.constant 0 : index
    %c0_4 = arith.constant 0 : index
    %3 = vector.load %arg4[%c0_3, %c0_4] : memref<1x128xf32, #tpu.memory_space<vmem>>, vector<1x128xf32>
    %4 = vector.broadcast %3 : vector<1x128xf32> to vector<16x128xf32>
    %5 = arith.addf %2, %4 : vector<16x128xf32>
    %6 = vector.shape_cast %5 : vector<16x128xf32> to vector<2x8x128xf32>
    %c0_5 = arith.constant 0 : index
    %c0_6 = arith.constant 0 : index
    %7 = vector.load %arg5[%c0_5, %c0_6] : memref<8x32xf32, #tpu.memory_space<vmem>>, vector<8x32xf32>
    %c0_7 = arith.constant 0 : index
    %c0_8 = arith.constant 0 : index
    %8 = vector.load %arg6[%c0_7, %c0_8] : memref<32x128xf32, #tpu.memory_space<vmem>>, vector<32x128xf32>
    %cst_9 = arith.constant dense<0.000000e+00> : vector<8x128xf32>
    %9 = tpu.matmul %7, %8, %cst_9 {dimension_numbers = #tpu.dot_dimension_numbers<[1], [0], [0], [1], [0, 0, 1, 1], [], []>} : vector<8x32xf32>, vector<32x128xf32>, vector<8x128xf32> -> vector<8x128xf32>
    %c0_10 = arith.constant 0 : index
    %c0_11 = arith.constant 0 : index
    %10 = vector.load %arg8[%c0_10, %c0_11] : memref<1x128xf32, #tpu.memory_space<vmem>>, vector<1x128xf32>
    %11 = vector.broadcast %10 : vector<1x128xf32> to vector<8x128xf32>
    %12 = arith.addf %9, %11 : vector<8x128xf32>
    %13 = vector.shape_cast %12 : vector<8x128xf32> to vector<1x8x128xf32>
    %14 = vector.shape_cast %13 : vector<1x8x128xf32> to vector<1x8x128xf32>
    %15 = vector.broadcast %14 : vector<1x8x128xf32> to vector<2x8x128xf32>
    %c0_12 = arith.constant 0 : index
    %c0_13 = arith.constant 0 : index
    %16 = vector.load %arg3[%c0_12, %c0_13] : memref<32x128xf32, #tpu.memory_space<vmem>>, vector<32x128xf32>
    %c0_14 = arith.constant 0 : index
    %c0_15 = arith.constant 0 : index
    %17 = vector.load %arg7[%c0_14, %c0_15] : memref<32x128xf32, #tpu.memory_space<vmem>>, vector<32x128xf32>
    %cst_16 = arith.constant 0.000000e+00 : f32
    %18 = vector.broadcast %cst_16 : f32 to vector<2x32xf32>
    %cst_17 = arith.constant 0.000000e+00 : f32
    %19 = vector.broadcast %cst_17 : f32 to vector<2x32xf32>
    %20 = vector.extract_strided_slice %6 {offsets = [0, 0, 0], sizes = [2, 1, 128], strides = [1, 1, 1]} : vector<2x8x128xf32> to vector<2x1x128xf32>
    %21 = vector.shape_cast %20 : vector<2x1x128xf32> to vector<2x128xf32>
    %cst_18 = arith.constant dense<0.000000e+00> : vector<2x128xf32>
    %22 = tpu.matmul %18, %16, %cst_18 {dimension_numbers = #tpu.dot_dimension_numbers<[1], [0], [0], [1], [0, 0, 1, 1], [], []>} : vector<2x32xf32>, vector<32x128xf32>, vector<2x128xf32> -> vector<2x128xf32>
    %23 = arith.addf %21, %22 : vector<2x128xf32>
    %24 = arith.negf %23 : vector<2x128xf32>
    %25 = math.exp %24 : vector<2x128xf32>
    %cst_19 = arith.constant 1.000000e+00 : f32
    %26 = vector.broadcast %cst_19 : f32 to vector<2x128xf32>
    %27 = arith.addf %26, %25 : vector<2x128xf32>
    %28 = arith.divf %26, %27 : vector<2x128xf32>
    %29 = math.tanh %23 : vector<2x128xf32>
    %30 = vector.extract_strided_slice %28 {offsets = [0, 0], sizes = [2, 32], strides = [1, 1]} : vector<2x128xf32> to vector<2x32xf32>
    %31 = vector.extract_strided_slice %28 {offsets = [0, 32], sizes = [2, 32], strides = [1, 1]} : vector<2x128xf32> to vector<2x32xf32>
    %32 = vector.extract_strided_slice %29 {offsets = [0, 64], sizes = [2, 32], strides = [1, 1]} : vector<2x128xf32> to vector<2x32xf32>
    %33 = vector.extract_strided_slice %28 {offsets = [0, 96], sizes = [2, 32], strides = [1, 1]} : vector<2x128xf32> to vector<2x32xf32>
    %34 = arith.mulf %31, %19 : vector<2x32xf32>
    %35 = arith.mulf %30, %32 : vector<2x32xf32>
    %36 = arith.addf %34, %35 : vector<2x32xf32>
    %37 = math.tanh %36 : vector<2x32xf32>
    %38 = arith.mulf %33, %37 : vector<2x32xf32>
    %39 = vector.extract_strided_slice %6 {offsets = [0, 1, 0], sizes = [2, 1, 128], strides = [1, 1, 1]} : vector<2x8x128xf32> to vector<2x1x128xf32>
    %40 = vector.shape_cast %39 : vector<2x1x128xf32> to vector<2x128xf32>
    %cst_20 = arith.constant dense<0.000000e+00> : vector<2x128xf32>
    %41 = tpu.matmul %38, %16, %cst_20 {dimension_numbers = #tpu.dot_dimension_numbers<[1], [0], [0], [1], [0, 0, 1, 1], [], []>} : vector<2x32xf32>, vector<32x128xf32>, vector<2x128xf32> -> vector<2x128xf32>
    %42 = arith.addf %40, %41 : vector<2x128xf32>
    %43 = arith.negf %42 : vector<2x128xf32>
    %44 = math.exp %43 : vector<2x128xf32>
    %cst_21 = arith.constant 1.000000e+00 : f32
    %45 = vector.broadcast %cst_21 : f32 to vector<2x128xf32>
    %46 = arith.addf %45, %44 : vector<2x128xf32>
    %47 = arith.divf %45, %46 : vector<2x128xf32>
    %48 = math.tanh %42 : vector<2x128xf32>
    %49 = vector.extract_strided_slice %47 {offsets = [0, 0], sizes = [2, 32], strides = [1, 1]} : vector<2x128xf32> to vector<2x32xf32>
    %50 = vector.extract_strided_slice %47 {offsets = [0, 32], sizes = [2, 32], strides = [1, 1]} : vector<2x128xf32> to vector<2x32xf32>
    %51 = vector.extract_strided_slice %48 {offsets = [0, 64], sizes = [2, 32], strides = [1, 1]} : vector<2x128xf32> to vector<2x32xf32>
    %52 = vector.extract_strided_slice %47 {offsets = [0, 96], sizes = [2, 32], strides = [1, 1]} : vector<2x128xf32> to vector<2x32xf32>
    %53 = arith.mulf %50, %36 : vector<2x32xf32>
    %54 = arith.mulf %49, %51 : vector<2x32xf32>
    %55 = arith.addf %53, %54 : vector<2x32xf32>
    %56 = math.tanh %55 : vector<2x32xf32>
    %57 = arith.mulf %52, %56 : vector<2x32xf32>
    %58 = vector.extract_strided_slice %6 {offsets = [0, 2, 0], sizes = [2, 1, 128], strides = [1, 1, 1]} : vector<2x8x128xf32> to vector<2x1x128xf32>
    %59 = vector.shape_cast %58 : vector<2x1x128xf32> to vector<2x128xf32>
    %cst_22 = arith.constant dense<0.000000e+00> : vector<2x128xf32>
    %60 = tpu.matmul %57, %16, %cst_22 {dimension_numbers = #tpu.dot_dimension_numbers<[1], [0], [0], [1], [0, 0, 1, 1], [], []>} : vector<2x32xf32>, vector<32x128xf32>, vector<2x128xf32> -> vector<2x128xf32>
    %61 = arith.addf %59, %60 : vector<2x128xf32>
    %62 = arith.negf %61 : vector<2x128xf32>
    %63 = math.exp %62 : vector<2x128xf32>
    %cst_23 = arith.constant 1.000000e+00 : f32
    %64 = vector.broadcast %cst_23 : f32 to vector<2x128xf32>
    %65 = arith.addf %64, %63 : vector<2x128xf32>
    %66 = arith.divf %64, %65 : vector<2x128xf32>
    %67 = math.tanh %61 : vector<2x128xf32>
    %68 = vector.extract_strided_slice %66 {offsets = [0, 0], sizes = [2, 32], strides = [1, 1]} : vector<2x128xf32> to vector<2x32xf32>
    %69 = vector.extract_strided_slice %66 {offsets = [0, 32], sizes = [2, 32], strides = [1, 1]} : vector<2x128xf32> to vector<2x32xf32>
    %70 = vector.extract_strided_slice %67 {offsets = [0, 64], sizes = [2, 32], strides = [1, 1]} : vector<2x128xf32> to vector<2x32xf32>
    %71 = vector.extract_strided_slice %66 {offsets = [0, 96], sizes = [2, 32], strides = [1, 1]} : vector<2x128xf32> to vector<2x32xf32>
    %72 = arith.mulf %69, %55 : vector<2x32xf32>
    %73 = arith.mulf %68, %70 : vector<2x32xf32>
    %74 = arith.addf %72, %73 : vector<2x32xf32>
    %75 = math.tanh %74 : vector<2x32xf32>
    %76 = arith.mulf %71, %75 : vector<2x32xf32>
    %77 = vector.extract_strided_slice %6 {offsets = [0, 3, 0], sizes = [2, 1, 128], strides = [1, 1, 1]} : vector<2x8x128xf32> to vector<2x1x128xf32>
    %78 = vector.shape_cast %77 : vector<2x1x128xf32> to vector<2x128xf32>
    %cst_24 = arith.constant dense<0.000000e+00> : vector<2x128xf32>
    %79 = tpu.matmul %76, %16, %cst_24 {dimension_numbers = #tpu.dot_dimension_numbers<[1], [0], [0], [1], [0, 0, 1, 1], [], []>} : vector<2x32xf32>, vector<32x128xf32>, vector<2x128xf32> -> vector<2x128xf32>
    %80 = arith.addf %78, %79 : vector<2x128xf32>
    %81 = arith.negf %80 : vector<2x128xf32>
    %82 = math.exp %81 : vector<2x128xf32>
    %cst_25 = arith.constant 1.000000e+00 : f32
    %83 = vector.broadcast %cst_25 : f32 to vector<2x128xf32>
    %84 = arith.addf %83, %82 : vector<2x128xf32>
    %85 = arith.divf %83, %84 : vector<2x128xf32>
    %86 = math.tanh %80 : vector<2x128xf32>
    %87 = vector.extract_strided_slice %85 {offsets = [0, 0], sizes = [2, 32], strides = [1, 1]} : vector<2x128xf32> to vector<2x32xf32>
    %88 = vector.extract_strided_slice %85 {offsets = [0, 32], sizes = [2, 32], strides = [1, 1]} : vector<2x128xf32> to vector<2x32xf32>
    %89 = vector.extract_strided_slice %86 {offsets = [0, 64], sizes = [2, 32], strides = [1, 1]} : vector<2x128xf32> to vector<2x32xf32>
    %90 = vector.extract_strided_slice %85 {offsets = [0, 96], sizes = [2, 32], strides = [1, 1]} : vector<2x128xf32> to vector<2x32xf32>
    %91 = arith.mulf %88, %74 : vector<2x32xf32>
    %92 = arith.mulf %87, %89 : vector<2x32xf32>
    %93 = arith.addf %91, %92 : vector<2x32xf32>
    %94 = math.tanh %93 : vector<2x32xf32>
    %95 = arith.mulf %90, %94 : vector<2x32xf32>
    %96 = vector.extract_strided_slice %6 {offsets = [0, 4, 0], sizes = [2, 1, 128], strides = [1, 1, 1]} : vector<2x8x128xf32> to vector<2x1x128xf32>
    %97 = vector.shape_cast %96 : vector<2x1x128xf32> to vector<2x128xf32>
    %cst_26 = arith.constant dense<0.000000e+00> : vector<2x128xf32>
    %98 = tpu.matmul %95, %16, %cst_26 {dimension_numbers = #tpu.dot_dimension_numbers<[1], [0], [0], [1], [0, 0, 1, 1], [], []>} : vector<2x32xf32>, vector<32x128xf32>, vector<2x128xf32> -> vector<2x128xf32>
    %99 = arith.addf %97, %98 : vector<2x128xf32>
    %100 = arith.negf %99 : vector<2x128xf32>
    %101 = math.exp %100 : vector<2x128xf32>
    %cst_27 = arith.constant 1.000000e+00 : f32
    %102 = vector.broadcast %cst_27 : f32 to vector<2x128xf32>
    %103 = arith.addf %102, %101 : vector<2x128xf32>
    %104 = arith.divf %102, %103 : vector<2x128xf32>
    %105 = math.tanh %99 : vector<2x128xf32>
    %106 = vector.extract_strided_slice %104 {offsets = [0, 0], sizes = [2, 32], strides = [1, 1]} : vector<2x128xf32> to vector<2x32xf32>
    %107 = vector.extract_strided_slice %104 {offsets = [0, 32], sizes = [2, 32], strides = [1, 1]} : vector<2x128xf32> to vector<2x32xf32>
    %108 = vector.extract_strided_slice %105 {offsets = [0, 64], sizes = [2, 32], strides = [1, 1]} : vector<2x128xf32> to vector<2x32xf32>
    %109 = vector.extract_strided_slice %104 {offsets = [0, 96], sizes = [2, 32], strides = [1, 1]} : vector<2x128xf32> to vector<2x32xf32>
    %110 = arith.mulf %107, %93 : vector<2x32xf32>
    %111 = arith.mulf %106, %108 : vector<2x32xf32>
    %112 = arith.addf %110, %111 : vector<2x32xf32>
    %113 = math.tanh %112 : vector<2x32xf32>
    %114 = arith.mulf %109, %113 : vector<2x32xf32>
    %115 = vector.extract_strided_slice %6 {offsets = [0, 5, 0], sizes = [2, 1, 128], strides = [1, 1, 1]} : vector<2x8x128xf32> to vector<2x1x128xf32>
    %116 = vector.shape_cast %115 : vector<2x1x128xf32> to vector<2x128xf32>
    %cst_28 = arith.constant dense<0.000000e+00> : vector<2x128xf32>
    %117 = tpu.matmul %114, %16, %cst_28 {dimension_numbers = #tpu.dot_dimension_numbers<[1], [0], [0], [1], [0, 0, 1, 1], [], []>} : vector<2x32xf32>, vector<32x128xf32>, vector<2x128xf32> -> vector<2x128xf32>
    %118 = arith.addf %116, %117 : vector<2x128xf32>
    %119 = arith.negf %118 : vector<2x128xf32>
    %120 = math.exp %119 : vector<2x128xf32>
    %cst_29 = arith.constant 1.000000e+00 : f32
    %121 = vector.broadcast %cst_29 : f32 to vector<2x128xf32>
    %122 = arith.addf %121, %120 : vector<2x128xf32>
    %123 = arith.divf %121, %122 : vector<2x128xf32>
    %124 = math.tanh %118 : vector<2x128xf32>
    %125 = vector.extract_strided_slice %123 {offsets = [0, 0], sizes = [2, 32], strides = [1, 1]} : vector<2x128xf32> to vector<2x32xf32>
    %126 = vector.extract_strided_slice %123 {offsets = [0, 32], sizes = [2, 32], strides = [1, 1]} : vector<2x128xf32> to vector<2x32xf32>
    %127 = vector.extract_strided_slice %124 {offsets = [0, 64], sizes = [2, 32], strides = [1, 1]} : vector<2x128xf32> to vector<2x32xf32>
    %128 = vector.extract_strided_slice %123 {offsets = [0, 96], sizes = [2, 32], strides = [1, 1]} : vector<2x128xf32> to vector<2x32xf32>
    %129 = arith.mulf %126, %112 : vector<2x32xf32>
    %130 = arith.mulf %125, %127 : vector<2x32xf32>
    %131 = arith.addf %129, %130 : vector<2x32xf32>
    %132 = math.tanh %131 : vector<2x32xf32>
    %133 = arith.mulf %128, %132 : vector<2x32xf32>
    %134 = vector.extract_strided_slice %6 {offsets = [0, 6, 0], sizes = [2, 1, 128], strides = [1, 1, 1]} : vector<2x8x128xf32> to vector<2x1x128xf32>
    %135 = vector.shape_cast %134 : vector<2x1x128xf32> to vector<2x128xf32>
    %cst_30 = arith.constant dense<0.000000e+00> : vector<2x128xf32>
    %136 = tpu.matmul %133, %16, %cst_30 {dimension_numbers = #tpu.dot_dimension_numbers<[1], [0], [0], [1], [0, 0, 1, 1], [], []>} : vector<2x32xf32>, vector<32x128xf32>, vector<2x128xf32> -> vector<2x128xf32>
    %137 = arith.addf %135, %136 : vector<2x128xf32>
    %138 = arith.negf %137 : vector<2x128xf32>
    %139 = math.exp %138 : vector<2x128xf32>
    %cst_31 = arith.constant 1.000000e+00 : f32
    %140 = vector.broadcast %cst_31 : f32 to vector<2x128xf32>
    %141 = arith.addf %140, %139 : vector<2x128xf32>
    %142 = arith.divf %140, %141 : vector<2x128xf32>
    %143 = math.tanh %137 : vector<2x128xf32>
    %144 = vector.extract_strided_slice %142 {offsets = [0, 0], sizes = [2, 32], strides = [1, 1]} : vector<2x128xf32> to vector<2x32xf32>
    %145 = vector.extract_strided_slice %142 {offsets = [0, 32], sizes = [2, 32], strides = [1, 1]} : vector<2x128xf32> to vector<2x32xf32>
    %146 = vector.extract_strided_slice %143 {offsets = [0, 64], sizes = [2, 32], strides = [1, 1]} : vector<2x128xf32> to vector<2x32xf32>
    %147 = vector.extract_strided_slice %142 {offsets = [0, 96], sizes = [2, 32], strides = [1, 1]} : vector<2x128xf32> to vector<2x32xf32>
    %148 = arith.mulf %145, %131 : vector<2x32xf32>
    %149 = arith.mulf %144, %146 : vector<2x32xf32>
    %150 = arith.addf %148, %149 : vector<2x32xf32>
    %151 = math.tanh %150 : vector<2x32xf32>
    %152 = arith.mulf %147, %151 : vector<2x32xf32>
    %153 = vector.extract_strided_slice %6 {offsets = [0, 7, 0], sizes = [2, 1, 128], strides = [1, 1, 1]} : vector<2x8x128xf32> to vector<2x1x128xf32>
    %154 = vector.shape_cast %153 : vector<2x1x128xf32> to vector<2x128xf32>
    %cst_32 = arith.constant dense<0.000000e+00> : vector<2x128xf32>
    %155 = tpu.matmul %152, %16, %cst_32 {dimension_numbers = #tpu.dot_dimension_numbers<[1], [0], [0], [1], [0, 0, 1, 1], [], []>} : vector<2x32xf32>, vector<32x128xf32>, vector<2x128xf32> -> vector<2x128xf32>
    %156 = arith.addf %154, %155 : vector<2x128xf32>
    %157 = arith.negf %156 : vector<2x128xf32>
    %158 = math.exp %157 : vector<2x128xf32>
    %cst_33 = arith.constant 1.000000e+00 : f32
    %159 = vector.broadcast %cst_33 : f32 to vector<2x128xf32>
    %160 = arith.addf %159, %158 : vector<2x128xf32>
    %161 = arith.divf %159, %160 : vector<2x128xf32>
    %162 = math.tanh %156 : vector<2x128xf32>
    %163 = vector.extract_strided_slice %161 {offsets = [0, 0], sizes = [2, 32], strides = [1, 1]} : vector<2x128xf32> to vector<2x32xf32>
    %164 = vector.extract_strided_slice %161 {offsets = [0, 32], sizes = [2, 32], strides = [1, 1]} : vector<2x128xf32> to vector<2x32xf32>
    %165 = vector.extract_strided_slice %162 {offsets = [0, 64], sizes = [2, 32], strides = [1, 1]} : vector<2x128xf32> to vector<2x32xf32>
    %166 = vector.extract_strided_slice %161 {offsets = [0, 96], sizes = [2, 32], strides = [1, 1]} : vector<2x128xf32> to vector<2x32xf32>
    %167 = arith.mulf %164, %150 : vector<2x32xf32>
    %168 = arith.mulf %163, %165 : vector<2x32xf32>
    %169 = arith.addf %167, %168 : vector<2x32xf32>
    %170 = math.tanh %169 : vector<2x32xf32>
    %171 = arith.mulf %166, %170 : vector<2x32xf32>
    %cst_34 = arith.constant 0.000000e+00 : f32
    %172 = vector.broadcast %cst_34 : f32 to vector<2x32xf32>
    %173 = vector.extract_strided_slice %15 {offsets = [0, 0, 0], sizes = [2, 1, 128], strides = [1, 1, 1]} : vector<2x8x128xf32> to vector<2x1x128xf32>
    %174 = vector.shape_cast %173 : vector<2x1x128xf32> to vector<2x128xf32>
    %cst_35 = arith.constant dense<0.000000e+00> : vector<2x128xf32>
    %175 = tpu.matmul %171, %17, %cst_35 {dimension_numbers = #tpu.dot_dimension_numbers<[1], [0], [0], [1], [0, 0, 1, 1], [], []>} : vector<2x32xf32>, vector<32x128xf32>, vector<2x128xf32> -> vector<2x128xf32>
    %176 = arith.addf %174, %175 : vector<2x128xf32>
    %177 = arith.negf %176 : vector<2x128xf32>
    %178 = math.exp %177 : vector<2x128xf32>
    %cst_36 = arith.constant 1.000000e+00 : f32
    %179 = vector.broadcast %cst_36 : f32 to vector<2x128xf32>
    %180 = arith.addf %179, %178 : vector<2x128xf32>
    %181 = arith.divf %179, %180 : vector<2x128xf32>
    %182 = math.tanh %176 : vector<2x128xf32>
    %183 = vector.extract_strided_slice %181 {offsets = [0, 0], sizes = [2, 32], strides = [1, 1]} : vector<2x128xf32> to vector<2x32xf32>
    %184 = vector.extract_strided_slice %181 {offsets = [0, 32], sizes = [2, 32], strides = [1, 1]} : vector<2x128xf32> to vector<2x32xf32>
    %185 = vector.extract_strided_slice %182 {offsets = [0, 64], sizes = [2, 32], strides = [1, 1]} : vector<2x128xf32> to vector<2x32xf32>
    %186 = vector.extract_strided_slice %181 {offsets = [0, 96], sizes = [2, 32], strides = [1, 1]} : vector<2x128xf32> to vector<2x32xf32>
    %187 = arith.mulf %184, %172 : vector<2x32xf32>
    %188 = arith.mulf %183, %185 : vector<2x32xf32>
    %189 = arith.addf %187, %188 : vector<2x32xf32>
    %190 = math.tanh %189 : vector<2x32xf32>
    %191 = arith.mulf %186, %190 : vector<2x32xf32>
    %192 = vector.extract_strided_slice %191 {offsets = [0, 0], sizes = [1, 32], strides = [1, 1]} : vector<2x32xf32> to vector<1x32xf32>
    %c0_37 = arith.constant 0 : index
    %c0_38 = arith.constant 0 : index
    %193 = vector.load %arg12[%c0_37, %c0_38] : memref<16x32xf32, #tpu.memory_space<vmem>>, vector<1x32xf32>
    tpu.vector_store %arg12[%c0_37, %c0_38], %192 {strides = array<i32>} : memref<16x32xf32, #tpu.memory_space<vmem>>, vector<1x32xf32>,
    %194 = vector.extract_strided_slice %191 {offsets = [1, 0], sizes = [1, 32], strides = [1, 1]} : vector<2x32xf32> to vector<1x32xf32>
    %c8 = arith.constant 8 : index
    %c0_39 = arith.constant 0 : index
    %195 = vector.load %arg12[%c8, %c0_39] : memref<16x32xf32, #tpu.memory_space<vmem>>, vector<1x32xf32>
    tpu.vector_store %arg12[%c8, %c0_39], %194 {strides = array<i32>} : memref<16x32xf32, #tpu.memory_space<vmem>>, vector<1x32xf32>,
    %196 = vector.extract_strided_slice %15 {offsets = [0, 1, 0], sizes = [2, 1, 128], strides = [1, 1, 1]} : vector<2x8x128xf32> to vector<2x1x128xf32>
    %197 = vector.shape_cast %196 : vector<2x1x128xf32> to vector<2x128xf32>
    %cst_40 = arith.constant dense<0.000000e+00> : vector<2x128xf32>
    %198 = tpu.matmul %191, %17, %cst_40 {dimension_numbers = #tpu.dot_dimension_numbers<[1], [0], [0], [1], [0, 0, 1, 1], [], []>} : vector<2x32xf32>, vector<32x128xf32>, vector<2x128xf32> -> vector<2x128xf32>
    %199 = arith.addf %197, %198 : vector<2x128xf32>
    %200 = arith.negf %199 : vector<2x128xf32>
    %201 = math.exp %200 : vector<2x128xf32>
    %cst_41 = arith.constant 1.000000e+00 : f32
    %202 = vector.broadcast %cst_41 : f32 to vector<2x128xf32>
    %203 = arith.addf %202, %201 : vector<2x128xf32>
    %204 = arith.divf %202, %203 : vector<2x128xf32>
    %205 = math.tanh %199 : vector<2x128xf32>
    %206 = vector.extract_strided_slice %204 {offsets = [0, 0], sizes = [2, 32], strides = [1, 1]} : vector<2x128xf32> to vector<2x32xf32>
    %207 = vector.extract_strided_slice %204 {offsets = [0, 32], sizes = [2, 32], strides = [1, 1]} : vector<2x128xf32> to vector<2x32xf32>
    %208 = vector.extract_strided_slice %205 {offsets = [0, 64], sizes = [2, 32], strides = [1, 1]} : vector<2x128xf32> to vector<2x32xf32>
    %209 = vector.extract_strided_slice %204 {offsets = [0, 96], sizes = [2, 32], strides = [1, 1]} : vector<2x128xf32> to vector<2x32xf32>
    %210 = arith.mulf %207, %189 : vector<2x32xf32>
    %211 = arith.mulf %206, %208 : vector<2x32xf32>
    %212 = arith.addf %210, %211 : vector<2x32xf32>
    %213 = math.tanh %212 : vector<2x32xf32>
    %214 = arith.mulf %209, %213 : vector<2x32xf32>
    %215 = vector.extract_strided_slice %214 {offsets = [0, 0], sizes = [1, 32], strides = [1, 1]} : vector<2x32xf32> to vector<1x32xf32>
    %c1 = arith.constant 1 : index
    %c0_42 = arith.constant 0 : index
    %216 = vector.load %arg12[%c1, %c0_42] : memref<16x32xf32, #tpu.memory_space<vmem>>, vector<1x32xf32>
    tpu.vector_store %arg12[%c1, %c0_42], %215 {strides = array<i32>} : memref<16x32xf32, #tpu.memory_space<vmem>>, vector<1x32xf32>,
    %217 = vector.extract_strided_slice %214 {offsets = [1, 0], sizes = [1, 32], strides = [1, 1]} : vector<2x32xf32> to vector<1x32xf32>
    %c9 = arith.constant 9 : index
    %c0_43 = arith.constant 0 : index
    %218 = vector.load %arg12[%c9, %c0_43] : memref<16x32xf32, #tpu.memory_space<vmem>>, vector<1x32xf32>
    tpu.vector_store %arg12[%c9, %c0_43], %217 {strides = array<i32>} : memref<16x32xf32, #tpu.memory_space<vmem>>, vector<1x32xf32>,
    %219 = vector.extract_strided_slice %15 {offsets = [0, 2, 0], sizes = [2, 1, 128], strides = [1, 1, 1]} : vector<2x8x128xf32> to vector<2x1x128xf32>
    %220 = vector.shape_cast %219 : vector<2x1x128xf32> to vector<2x128xf32>
    %cst_44 = arith.constant dense<0.000000e+00> : vector<2x128xf32>
    %221 = tpu.matmul %214, %17, %cst_44 {dimension_numbers = #tpu.dot_dimension_numbers<[1], [0], [0], [1], [0, 0, 1, 1], [], []>} : vector<2x32xf32>, vector<32x128xf32>, vector<2x128xf32> -> vector<2x128xf32>
    %222 = arith.addf %220, %221 : vector<2x128xf32>
    %223 = arith.negf %222 : vector<2x128xf32>
    %224 = math.exp %223 : vector<2x128xf32>
    %cst_45 = arith.constant 1.000000e+00 : f32
    %225 = vector.broadcast %cst_45 : f32 to vector<2x128xf32>
    %226 = arith.addf %225, %224 : vector<2x128xf32>
    %227 = arith.divf %225, %226 : vector<2x128xf32>
    %228 = math.tanh %222 : vector<2x128xf32>
    %229 = vector.extract_strided_slice %227 {offsets = [0, 0], sizes = [2, 32], strides = [1, 1]} : vector<2x128xf32> to vector<2x32xf32>
    %230 = vector.extract_strided_slice %227 {offsets = [0, 32], sizes = [2, 32], strides = [1, 1]} : vector<2x128xf32> to vector<2x32xf32>
    %231 = vector.extract_strided_slice %228 {offsets = [0, 64], sizes = [2, 32], strides = [1, 1]} : vector<2x128xf32> to vector<2x32xf32>
    %232 = vector.extract_strided_slice %227 {offsets = [0, 96], sizes = [2, 32], strides = [1, 1]} : vector<2x128xf32> to vector<2x32xf32>
    %233 = arith.mulf %230, %212 : vector<2x32xf32>
    %234 = arith.mulf %229, %231 : vector<2x32xf32>
    %235 = arith.addf %233, %234 : vector<2x32xf32>
    %236 = math.tanh %235 : vector<2x32xf32>
    %237 = arith.mulf %232, %236 : vector<2x32xf32>
    %238 = vector.extract_strided_slice %237 {offsets = [0, 0], sizes = [1, 32], strides = [1, 1]} : vector<2x32xf32> to vector<1x32xf32>
    %c2 = arith.constant 2 : index
    %c0_46 = arith.constant 0 : index
    %239 = vector.load %arg12[%c2, %c0_46] : memref<16x32xf32, #tpu.memory_space<vmem>>, vector<1x32xf32>
    tpu.vector_store %arg12[%c2, %c0_46], %238 {strides = array<i32>} : memref<16x32xf32, #tpu.memory_space<vmem>>, vector<1x32xf32>,
    %240 = vector.extract_strided_slice %237 {offsets = [1, 0], sizes = [1, 32], strides = [1, 1]} : vector<2x32xf32> to vector<1x32xf32>
    %c10 = arith.constant 10 : index
    %c0_47 = arith.constant 0 : index
    %241 = vector.load %arg12[%c10, %c0_47] : memref<16x32xf32, #tpu.memory_space<vmem>>, vector<1x32xf32>
    tpu.vector_store %arg12[%c10, %c0_47], %240 {strides = array<i32>} : memref<16x32xf32, #tpu.memory_space<vmem>>, vector<1x32xf32>,
    %242 = vector.extract_strided_slice %15 {offsets = [0, 3, 0], sizes = [2, 1, 128], strides = [1, 1, 1]} : vector<2x8x128xf32> to vector<2x1x128xf32>
    %243 = vector.shape_cast %242 : vector<2x1x128xf32> to vector<2x128xf32>
    %cst_48 = arith.constant dense<0.000000e+00> : vector<2x128xf32>
    %244 = tpu.matmul %237, %17, %cst_48 {dimension_numbers = #tpu.dot_dimension_numbers<[1], [0], [0], [1], [0, 0, 1, 1], [], []>} : vector<2x32xf32>, vector<32x128xf32>, vector<2x128xf32> -> vector<2x128xf32>
    %245 = arith.addf %243, %244 : vector<2x128xf32>
    %246 = arith.negf %245 : vector<2x128xf32>
    %247 = math.exp %246 : vector<2x128xf32>
    %cst_49 = arith.constant 1.000000e+00 : f32
    %248 = vector.broadcast %cst_49 : f32 to vector<2x128xf32>
    %249 = arith.addf %248, %247 : vector<2x128xf32>
    %250 = arith.divf %248, %249 : vector<2x128xf32>
    %251 = math.tanh %245 : vector<2x128xf32>
    %252 = vector.extract_strided_slice %250 {offsets = [0, 0], sizes = [2, 32], strides = [1, 1]} : vector<2x128xf32> to vector<2x32xf32>
    %253 = vector.extract_strided_slice %250 {offsets = [0, 32], sizes = [2, 32], strides = [1, 1]} : vector<2x128xf32> to vector<2x32xf32>
    %254 = vector.extract_strided_slice %251 {offsets = [0, 64], sizes = [2, 32], strides = [1, 1]} : vector<2x128xf32> to vector<2x32xf32>
    %255 = vector.extract_strided_slice %250 {offsets = [0, 96], sizes = [2, 32], strides = [1, 1]} : vector<2x128xf32> to vector<2x32xf32>
    %256 = arith.mulf %253, %235 : vector<2x32xf32>
    %257 = arith.mulf %252, %254 : vector<2x32xf32>
    %258 = arith.addf %256, %257 : vector<2x32xf32>
    %259 = math.tanh %258 : vector<2x32xf32>
    %260 = arith.mulf %255, %259 : vector<2x32xf32>
    %261 = vector.extract_strided_slice %260 {offsets = [0, 0], sizes = [1, 32], strides = [1, 1]} : vector<2x32xf32> to vector<1x32xf32>
    %c3 = arith.constant 3 : index
    %c0_50 = arith.constant 0 : index
    %262 = vector.load %arg12[%c3, %c0_50] : memref<16x32xf32, #tpu.memory_space<vmem>>, vector<1x32xf32>
    tpu.vector_store %arg12[%c3, %c0_50], %261 {strides = array<i32>} : memref<16x32xf32, #tpu.memory_space<vmem>>, vector<1x32xf32>,
    %263 = vector.extract_strided_slice %260 {offsets = [1, 0], sizes = [1, 32], strides = [1, 1]} : vector<2x32xf32> to vector<1x32xf32>
    %c11 = arith.constant 11 : index
    %c0_51 = arith.constant 0 : index
    %264 = vector.load %arg12[%c11, %c0_51] : memref<16x32xf32, #tpu.memory_space<vmem>>, vector<1x32xf32>
    tpu.vector_store %arg12[%c11, %c0_51], %263 {strides = array<i32>} : memref<16x32xf32, #tpu.memory_space<vmem>>, vector<1x32xf32>,
    %265 = vector.extract_strided_slice %15 {offsets = [0, 4, 0], sizes = [2, 1, 128], strides = [1, 1, 1]} : vector<2x8x128xf32> to vector<2x1x128xf32>
    %266 = vector.shape_cast %265 : vector<2x1x128xf32> to vector<2x128xf32>
    %cst_52 = arith.constant dense<0.000000e+00> : vector<2x128xf32>
    %267 = tpu.matmul %260, %17, %cst_52 {dimension_numbers = #tpu.dot_dimension_numbers<[1], [0], [0], [1], [0, 0, 1, 1], [], []>} : vector<2x32xf32>, vector<32x128xf32>, vector<2x128xf32> -> vector<2x128xf32>
    %268 = arith.addf %266, %267 : vector<2x128xf32>
    %269 = arith.negf %268 : vector<2x128xf32>
    %270 = math.exp %269 : vector<2x128xf32>
    %cst_53 = arith.constant 1.000000e+00 : f32
    %271 = vector.broadcast %cst_53 : f32 to vector<2x128xf32>
    %272 = arith.addf %271, %270 : vector<2x128xf32>
    %273 = arith.divf %271, %272 : vector<2x128xf32>
    %274 = math.tanh %268 : vector<2x128xf32>
    %275 = vector.extract_strided_slice %273 {offsets = [0, 0], sizes = [2, 32], strides = [1, 1]} : vector<2x128xf32> to vector<2x32xf32>
    %276 = vector.extract_strided_slice %273 {offsets = [0, 32], sizes = [2, 32], strides = [1, 1]} : vector<2x128xf32> to vector<2x32xf32>
    %277 = vector.extract_strided_slice %274 {offsets = [0, 64], sizes = [2, 32], strides = [1, 1]} : vector<2x128xf32> to vector<2x32xf32>
    %278 = vector.extract_strided_slice %273 {offsets = [0, 96], sizes = [2, 32], strides = [1, 1]} : vector<2x128xf32> to vector<2x32xf32>
    %279 = arith.mulf %276, %258 : vector<2x32xf32>
    %280 = arith.mulf %275, %277 : vector<2x32xf32>
    %281 = arith.addf %279, %280 : vector<2x32xf32>
    %282 = math.tanh %281 : vector<2x32xf32>
    %283 = arith.mulf %278, %282 : vector<2x32xf32>
    %284 = vector.extract_strided_slice %283 {offsets = [0, 0], sizes = [1, 32], strides = [1, 1]} : vector<2x32xf32> to vector<1x32xf32>
    %c4 = arith.constant 4 : index
    %c0_54 = arith.constant 0 : index
    %285 = vector.load %arg12[%c4, %c0_54] : memref<16x32xf32, #tpu.memory_space<vmem>>, vector<1x32xf32>
    tpu.vector_store %arg12[%c4, %c0_54], %284 {strides = array<i32>} : memref<16x32xf32, #tpu.memory_space<vmem>>, vector<1x32xf32>,
    %286 = vector.extract_strided_slice %283 {offsets = [1, 0], sizes = [1, 32], strides = [1, 1]} : vector<2x32xf32> to vector<1x32xf32>
    %c12 = arith.constant 12 : index
    %c0_55 = arith.constant 0 : index
    %287 = vector.load %arg12[%c12, %c0_55] : memref<16x32xf32, #tpu.memory_space<vmem>>, vector<1x32xf32>
    tpu.vector_store %arg12[%c12, %c0_55], %286 {strides = array<i32>} : memref<16x32xf32, #tpu.memory_space<vmem>>, vector<1x32xf32>,
    %288 = vector.extract_strided_slice %15 {offsets = [0, 5, 0], sizes = [2, 1, 128], strides = [1, 1, 1]} : vector<2x8x128xf32> to vector<2x1x128xf32>
    %289 = vector.shape_cast %288 : vector<2x1x128xf32> to vector<2x128xf32>
    %cst_56 = arith.constant dense<0.000000e+00> : vector<2x128xf32>
    %290 = tpu.matmul %283, %17, %cst_56 {dimension_numbers = #tpu.dot_dimension_numbers<[1], [0], [0], [1], [0, 0, 1, 1], [], []>} : vector<2x32xf32>, vector<32x128xf32>, vector<2x128xf32> -> vector<2x128xf32>
    %291 = arith.addf %289, %290 : vector<2x128xf32>
    %292 = arith.negf %291 : vector<2x128xf32>
    %293 = math.exp %292 : vector<2x128xf32>
    %cst_57 = arith.constant 1.000000e+00 : f32
    %294 = vector.broadcast %cst_57 : f32 to vector<2x128xf32>
    %295 = arith.addf %294, %293 : vector<2x128xf32>
    %296 = arith.divf %294, %295 : vector<2x128xf32>
    %297 = math.tanh %291 : vector<2x128xf32>
    %298 = vector.extract_strided_slice %296 {offsets = [0, 0], sizes = [2, 32], strides = [1, 1]} : vector<2x128xf32> to vector<2x32xf32>
    %299 = vector.extract_strided_slice %296 {offsets = [0, 32], sizes = [2, 32], strides = [1, 1]} : vector<2x128xf32> to vector<2x32xf32>
    %300 = vector.extract_strided_slice %297 {offsets = [0, 64], sizes = [2, 32], strides = [1, 1]} : vector<2x128xf32> to vector<2x32xf32>
    %301 = vector.extract_strided_slice %296 {offsets = [0, 96], sizes = [2, 32], strides = [1, 1]} : vector<2x128xf32> to vector<2x32xf32>
    %302 = arith.mulf %299, %281 : vector<2x32xf32>
    %303 = arith.mulf %298, %300 : vector<2x32xf32>
    %304 = arith.addf %302, %303 : vector<2x32xf32>
    %305 = math.tanh %304 : vector<2x32xf32>
    %306 = arith.mulf %301, %305 : vector<2x32xf32>
    %307 = vector.extract_strided_slice %306 {offsets = [0, 0], sizes = [1, 32], strides = [1, 1]} : vector<2x32xf32> to vector<1x32xf32>
    %c5 = arith.constant 5 : index
    %c0_58 = arith.constant 0 : index
    %308 = vector.load %arg12[%c5, %c0_58] : memref<16x32xf32, #tpu.memory_space<vmem>>, vector<1x32xf32>
    tpu.vector_store %arg12[%c5, %c0_58], %307 {strides = array<i32>} : memref<16x32xf32, #tpu.memory_space<vmem>>, vector<1x32xf32>,
    %309 = vector.extract_strided_slice %306 {offsets = [1, 0], sizes = [1, 32], strides = [1, 1]} : vector<2x32xf32> to vector<1x32xf32>
    %c13 = arith.constant 13 : index
    %c0_59 = arith.constant 0 : index
    %310 = vector.load %arg12[%c13, %c0_59] : memref<16x32xf32, #tpu.memory_space<vmem>>, vector<1x32xf32>
    tpu.vector_store %arg12[%c13, %c0_59], %309 {strides = array<i32>} : memref<16x32xf32, #tpu.memory_space<vmem>>, vector<1x32xf32>,
    %311 = vector.extract_strided_slice %15 {offsets = [0, 6, 0], sizes = [2, 1, 128], strides = [1, 1, 1]} : vector<2x8x128xf32> to vector<2x1x128xf32>
    %312 = vector.shape_cast %311 : vector<2x1x128xf32> to vector<2x128xf32>
    %cst_60 = arith.constant dense<0.000000e+00> : vector<2x128xf32>
    %313 = tpu.matmul %306, %17, %cst_60 {dimension_numbers = #tpu.dot_dimension_numbers<[1], [0], [0], [1], [0, 0, 1, 1], [], []>} : vector<2x32xf32>, vector<32x128xf32>, vector<2x128xf32> -> vector<2x128xf32>
    %314 = arith.addf %312, %313 : vector<2x128xf32>
    %315 = arith.negf %314 : vector<2x128xf32>
    %316 = math.exp %315 : vector<2x128xf32>
    %cst_61 = arith.constant 1.000000e+00 : f32
    %317 = vector.broadcast %cst_61 : f32 to vector<2x128xf32>
    %318 = arith.addf %317, %316 : vector<2x128xf32>
    %319 = arith.divf %317, %318 : vector<2x128xf32>
    %320 = math.tanh %314 : vector<2x128xf32>
    %321 = vector.extract_strided_slice %319 {offsets = [0, 0], sizes = [2, 32], strides = [1, 1]} : vector<2x128xf32> to vector<2x32xf32>
    %322 = vector.extract_strided_slice %319 {offsets = [0, 32], sizes = [2, 32], strides = [1, 1]} : vector<2x128xf32> to vector<2x32xf32>
    %323 = vector.extract_strided_slice %320 {offsets = [0, 64], sizes = [2, 32], strides = [1, 1]} : vector<2x128xf32> to vector<2x32xf32>
    %324 = vector.extract_strided_slice %319 {offsets = [0, 96], sizes = [2, 32], strides = [1, 1]} : vector<2x128xf32> to vector<2x32xf32>
    %325 = arith.mulf %322, %304 : vector<2x32xf32>
    %326 = arith.mulf %321, %323 : vector<2x32xf32>
    %327 = arith.addf %325, %326 : vector<2x32xf32>
    %328 = math.tanh %327 : vector<2x32xf32>
    %329 = arith.mulf %324, %328 : vector<2x32xf32>
    %330 = vector.extract_strided_slice %329 {offsets = [0, 0], sizes = [1, 32], strides = [1, 1]} : vector<2x32xf32> to vector<1x32xf32>
    %c6 = arith.constant 6 : index
    %c0_62 = arith.constant 0 : index
    %331 = vector.load %arg12[%c6, %c0_62] : memref<16x32xf32, #tpu.memory_space<vmem>>, vector<1x32xf32>
    tpu.vector_store %arg12[%c6, %c0_62], %330 {strides = array<i32>} : memref<16x32xf32, #tpu.memory_space<vmem>>, vector<1x32xf32>,
    %332 = vector.extract_strided_slice %329 {offsets = [1, 0], sizes = [1, 32], strides = [1, 1]} : vector<2x32xf32> to vector<1x32xf32>
    %c14 = arith.constant 14 : index
    %c0_63 = arith.constant 0 : index
    %333 = vector.load %arg12[%c14, %c0_63] : memref<16x32xf32, #tpu.memory_space<vmem>>, vector<1x32xf32>
    tpu.vector_store %arg12[%c14, %c0_63], %332 {strides = array<i32>} : memref<16x32xf32, #tpu.memory_space<vmem>>, vector<1x32xf32>,
    %334 = vector.extract_strided_slice %15 {offsets = [0, 7, 0], sizes = [2, 1, 128], strides = [1, 1, 1]} : vector<2x8x128xf32> to vector<2x1x128xf32>
    %335 = vector.shape_cast %334 : vector<2x1x128xf32> to vector<2x128xf32>
    %cst_64 = arith.constant dense<0.000000e+00> : vector<2x128xf32>
    %336 = tpu.matmul %329, %17, %cst_64 {dimension_numbers = #tpu.dot_dimension_numbers<[1], [0], [0], [1], [0, 0, 1, 1], [], []>} : vector<2x32xf32>, vector<32x128xf32>, vector<2x128xf32> -> vector<2x128xf32>
    %337 = arith.addf %335, %336 : vector<2x128xf32>
    %338 = arith.negf %337 : vector<2x128xf32>
    %339 = math.exp %338 : vector<2x128xf32>
    %cst_65 = arith.constant 1.000000e+00 : f32
    %340 = vector.broadcast %cst_65 : f32 to vector<2x128xf32>
    %341 = arith.addf %340, %339 : vector<2x128xf32>
    %342 = arith.divf %340, %341 : vector<2x128xf32>
    %343 = math.tanh %337 : vector<2x128xf32>
    %344 = vector.extract_strided_slice %342 {offsets = [0, 0], sizes = [2, 32], strides = [1, 1]} : vector<2x128xf32> to vector<2x32xf32>
    %345 = vector.extract_strided_slice %342 {offsets = [0, 32], sizes = [2, 32], strides = [1, 1]} : vector<2x128xf32> to vector<2x32xf32>
    %346 = vector.extract_strided_slice %343 {offsets = [0, 64], sizes = [2, 32], strides = [1, 1]} : vector<2x128xf32> to vector<2x32xf32>
    %347 = vector.extract_strided_slice %342 {offsets = [0, 96], sizes = [2, 32], strides = [1, 1]} : vector<2x128xf32> to vector<2x32xf32>
    %348 = arith.mulf %345, %327 : vector<2x32xf32>
    %349 = arith.mulf %344, %346 : vector<2x32xf32>
    %350 = arith.addf %348, %349 : vector<2x32xf32>
    %351 = math.tanh %350 : vector<2x32xf32>
    %352 = arith.mulf %347, %351 : vector<2x32xf32>
    %353 = vector.extract_strided_slice %352 {offsets = [0, 0], sizes = [1, 32], strides = [1, 1]} : vector<2x32xf32> to vector<1x32xf32>
    %c7 = arith.constant 7 : index
    %c0_66 = arith.constant 0 : index
    %354 = vector.load %arg12[%c7, %c0_66] : memref<16x32xf32, #tpu.memory_space<vmem>>, vector<1x32xf32>
    tpu.vector_store %arg12[%c7, %c0_66], %353 {strides = array<i32>} : memref<16x32xf32, #tpu.memory_space<vmem>>, vector<1x32xf32>,
    %355 = vector.extract_strided_slice %352 {offsets = [1, 0], sizes = [1, 32], strides = [1, 1]} : vector<2x32xf32> to vector<1x32xf32>
    %c15 = arith.constant 15 : index
    %c0_67 = arith.constant 0 : index
    %356 = vector.load %arg12[%c15, %c0_67] : memref<16x32xf32, #tpu.memory_space<vmem>>, vector<1x32xf32>
    tpu.vector_store %arg12[%c15, %c0_67], %355 {strides = array<i32>} : memref<16x32xf32, #tpu.memory_space<vmem>>, vector<1x32xf32>,
    %c0_68 = arith.constant 0 : index
    %c0_69 = arith.constant 0 : index
    %357 = vector.load %arg12[%c0_68, %c0_69] : memref<16x32xf32, #tpu.memory_space<vmem>>, vector<16x32xf32>
    %c0_70 = arith.constant 0 : index
    %c0_71 = arith.constant 0 : index
    %358 = vector.load %arg9[%c0_70, %c0_71] : memref<32x16xf32, #tpu.memory_space<vmem>>, vector<32x16xf32>
    %cst_72 = arith.constant dense<0.000000e+00> : vector<16x16xf32>
    %359 = tpu.matmul %357, %358, %cst_72 {dimension_numbers = #tpu.dot_dimension_numbers<[1], [0], [0], [1], [0, 0, 1, 1], [], []>} : vector<16x32xf32>, vector<32x16xf32>, vector<16x16xf32> -> vector<16x16xf32>
    %c0_73 = arith.constant 0 : index
    %c0_74 = arith.constant 0 : index
    %360 = vector.load %arg10[%c0_73, %c0_74] : memref<1x16xf32, #tpu.memory_space<vmem>>, vector<1x16xf32>
    %361 = vector.broadcast %360 : vector<1x16xf32> to vector<16x16xf32>
    %362 = arith.addf %359, %361 : vector<16x16xf32>
    %c0_75 = arith.constant 0 : index
    %c0_76 = arith.constant 0 : index
    %363 = vector.load %arg11[%c0_75, %c0_76] : memref<16x16xf32, #tpu.memory_space<vmem>>, vector<16x16xf32>
    tpu.vector_store %arg11[%c0_75, %c0_76], %362 {strides = array<i32>} : memref<16x16xf32, #tpu.memory_space<vmem>>, vector<16x16xf32>,
    return
  }
  func.func @transform_0(%arg0: i32) -> (i32, i32) {
    %c0_i32 = arith.constant 0 : i32
    %c0_i32_0 = arith.constant 0 : i32
    %c0_i32_1 = arith.constant 0 : i32
    return %c0_i32, %c0_i32_0 : i32, i32
  }
  func.func @transform_1(%arg0: i32) -> (i32, i32) {
    %c0_i32 = arith.constant 0 : i32
    %c0_i32_0 = arith.constant 0 : i32
    %c0_i32_1 = arith.constant 0 : i32
    return %c0_i32, %c0_i32_0 : i32, i32
  }
  func.func @transform_2(%arg0: i32) -> (i32, i32) {
    %c0_i32 = arith.constant 0 : i32
    %c0_i32_0 = arith.constant 0 : i32
    %c0_i32_1 = arith.constant 0 : i32
    return %c0_i32, %c0_i32_0 : i32, i32
  }
  func.func @transform_3(%arg0: i32) -> (i32, i32) {
    %c0_i32 = arith.constant 0 : i32
    %c0_i32_0 = arith.constant 0 : i32
    %c0_i32_1 = arith.constant 0 : i32
    return %c0_i32, %c0_i32_0 : i32, i32
  }
  func.func @transform_4(%arg0: i32) -> (i32, i32) {
    %c0_i32 = arith.constant 0 : i32
    %c0_i32_0 = arith.constant 0 : i32
    %c0_i32_1 = arith.constant 0 : i32
    return %c0_i32, %c0_i32_0 : i32, i32
  }
  func.func @transform_5(%arg0: i32) -> (i32, i32) {
    %c0_i32 = arith.constant 0 : i32
    %c0_i32_0 = arith.constant 0 : i32
    %c0_i32_1 = arith.constant 0 : i32
    return %c0_i32, %c0_i32_0 : i32, i32
  }
  func.func @transform_6(%arg0: i32) -> (i32, i32) {
    %c0_i32 = arith.constant 0 : i32
    %c0_i32_0 = arith.constant 0 : i32
    %c0_i32_1 = arith.constant 0 : i32
    return %c0_i32, %c0_i32_0 : i32, i32
  }
  func.func @transform_7(%arg0: i32) -> (i32, i32) {
    %c0_i32 = arith.constant 0 : i32
    %c0_i32_0 = arith.constant 0 : i32
    %c0_i32_1 = arith.constant 0 : i32
    return %c0_i32, %c0_i32_0 : i32, i32
  }
  func.func @transform_8(%arg0: i32) -> (i32, i32) {
    %c0_i32 = arith.constant 0 : i32
    %c0_i32_0 = arith.constant 0 : i32
    %c0_i32_1 = arith.constant 0 : i32
    return %c0_i32, %c0_i32_0 : i32, i32
  }
  func.func @transform_9(%arg0: i32) -> (i32, i32) {
    %c0_i32 = arith.constant 0 : i32
    %c0_i32_0 = arith.constant 0 : i32
    %c0_i32_1 = arith.constant 0 : i32
    return %c0_i32, %c0_i32_0 : i32, i32
  }
  func.func @transform_10(%arg0: i32) -> (i32, i32) {
    %c0_i32 = arith.constant 0 : i32
    %c0_i32_0 = arith.constant 0 : i32
    %c0_i32_1 = arith.constant 0 : i32
    return %c0_i32, %c0_i32_0 : i32, i32
  }
}

</mosaic_0001>

<bundles_post_ra>
// kernel: tpu_custom_call.1
= control target key start
LH: loop header
LB: loop body
LE: loop exit
PB: predicated region body
PF: predicated region fallthrough
CT: control target
= control target key end

     0   :  { %15 = vsyncpa [#allocation4], 0  ;;  %s2472_s0 = inlined_call_operand.vmem [shape: f32[16,16], index: 0, kind: input, shape index: {}]   ;;  %s2473_s1 = inlined_call_operand.hbm [shape: f32[16,128], index: 1, kind: input, shape index: {}]   ;;  %s2474_s2 = inlined_call_operand.vmem [shape: f32[32,128], index: 2, kind: input, shape index: {}]   ;;  %s2475_s3 = inlined_call_operand.vmem [shape: f32[1,128], index: 3, kind: input, shape index: {}]   ;;  %s2476_s4 = inlined_call_operand.hbm [shape: f32[8,32], index: 4, kind: input, shape index: {}]   ;;  %s2477_s5 = inlined_call_operand.hbm [shape: f32[32,128], index: 5, kind: input, shape index: {}]   ;;  %s2478_s6 = inlined_call_operand.hbm [shape: f32[32,128], index: 6, kind: input, shape index: {}]   ;;  %s2479_s7 = inlined_call_operand.vmem [shape: f32[1,128], index: 7, kind: input, shape index: {}]   ;;  %s2480_s8 = inlined_call_operand.vmem [shape: f32[32,16], index: 8, kind: input, shape index: {}]   ;;  %s2481_s9 = inlined_call_operand.vmem [shape: f32[1,16], index: 9, kind: input, shape index: {}]   ;;  %s2482_s10 = inlined_call_operand.hbm [shape: f32[16,16], index: 10, kind: output, shape index: {}]  }
   0x1   :  { %16 = vsyncpa [#allocation7], 0 }
   0x2   :  { %17 = vsyncpa [#allocation10], 0  ;;  %s43_s15 = sshll.u32 %s2476_s4, 4  ;;  %s44_s15 = int_to_ptr.hbm [resolvable:$true] %s43_s15 }
   0x3   :  { %18 = vsyncpa [#allocation5], 0  ;;  %s2073_s16 = smov [#allocation6]   ;;  %s25_s20 = sshll.u32 %s2473_s1, 4  ;;  %s26_s20 = int_to_ptr.hbm [resolvable:$true] %s25_s20 }
   0x4   :  { %s45_s17 = sshll.u32 %s2073_s16, 4  ;;  %s2074_s21 = smov [#allocation3]   ;;  %s46_s17 = int_to_ptr.vmem [resolvable:$true] %s45_s17 }
   0x5   :  { %48 = dma.hbm_to_vmem [thread:$0]  %s44_s15, 128, %s46_s17, [#allocation7]  }
   0x6   :  { %s27_s22 = sshll.u32 %s2074_s21, 4  ;;  %s2075_s23 = smov 128   ;;  %s28_s22 = int_to_ptr.vmem [resolvable:$true] %s27_s22 }
   0x7   :  { %s2076_s24 = smov 8   ;;  %s53_s26 = sshll.u32 %s2477_s5, 4  ;;  %s54_s26 = int_to_ptr.hbm [resolvable:$true] %s53_s26 }
   0x8   :  { %33 = dma.hbm_to_vmem [thread:$0]  %s26_s20, 256, %s28_s22, [#allocation4], %s2075_s23, %s2075_s23, %s2076_s24  }
   0x9   :  { %s2077_s27 = smov [#allocation8]   ;;  %s66_s30 = sshll.u32 %s2478_s6, 4  ;;  %s67_s30 = int_to_ptr.hbm [resolvable:$true] %s66_s30 }
   0xa   :  { %s55_s28 = sshll.u32 %s2077_s27, 4  ;;  %s2078_s11 = smov [#allocation9]   ;;  %s56_s28 = int_to_ptr.vmem [resolvable:$true] %s55_s28 }
   0xb   :  { %61 = dma.hbm_to_vmem [thread:$0]  %s54_s26, 512, %s56_s28, [#allocation7], %s2075_s23, %s2075_s23, %s2076_s24  }
   0xc   :  { %s68_s12 = sshll.u32 %s2078_s11, 4  ;;  %s69_s12 = int_to_ptr.vmem [resolvable:$true] %s68_s12 }
   0xd   :  { %74 = dma.hbm_to_vmem [thread:$0]  %s67_s30, 512, %s69_s12, [#allocation10], %s2075_s23, %s2075_s23, %s2076_s24  }
   0xe   :  { %2065 = dma.done.wait [#allocation4], 256  }
   0xf   :  { %2066 = vsyncadd [#allocation4], 4294967040 }
  0x10   :  { %2067 = dma.done.wait [#allocation7], 640  }
  0x11   :  { %2068 = vsyncadd [#allocation7], 4294966656 }
  0x12   :  { %2069 = dma.done.wait [#allocation10], 512  }
  0x13   :  { %2070 = vsyncadd [#allocation10], 4294966784  ;;  %v2162_v0 = vld [vmem:[%s2474_s2 + $0x18] sm:$0xff]  ;;  %v2167_v2 = vld [vmem:[%s2474_s2 + $0x10] sm:$0xff]  ;;  %vm105_vm0 = vcmask 130048   ;;  %v2079_v7 = vmov 0.0  }
  0x14   :  { %v100_v1 = vld [vmem:[#allocation3 + $0x8] sm:$0xff]  ;;  %191 = vmatpush.msra.mxu2 %v2162_v0  ;;  %v99_v3 = vld [vmem:[#allocation3] sm:$0xff]  ;;  %v97_v4 = vld [vmem:[%s2472_s0] sm:$0xff]  ;;  %646 = vmatpush.msra.mxu3 %v2162_v0  ;;  %s2080_s4 = smov 64   ;;  %vm282_vm9 = vcmask 1041409   ;;  %vm144_vm10 = vcmask 261120  }
  0x15   :  { %126 = vmatpush.msra.mxu0 %v100_v1  ;;  %v2176_v5 = vld [vmem:[%s2474_s2 + $0x8] sm:$0xff]  ;;  %v2184_v6 = vld [vmem:[%s2474_s2] sm:$0xff]  ;;  %s1681_s16 = sshll.u32 %s2482_s10, 4  ;;  %s1682_s16 = int_to_ptr.hbm [resolvable:$true] %s1681_s16 }
  0x16   :  { %192 = vmatpush.msra.mxu2 %v2167_v2  ;;  %647 = vmatpush.msra.mxu3 %v2167_v2  ;;  %v98_v8 = vld [vmem:[%s2472_s0 + $0x8] sm:$0xff]  ;;  %v1750_v10 = vld [vmem:[%s2475_s3] ss:$0 sm:$0xff]  ;;  %s2081_s3 = smov 32  }
  0x17   :  { %127 = vmatpush.msra.mxu0 %v99_v3 }
  0x18   :  { %1696 = vmatmul.msk.f32.vlgmr.msra.gmra.mxu0 %vm105_vm0, %v97_v4  ;;  %193 = vmatpush.msra.mxu2 %v2176_v5 }
  0x19   :  { %300 = vmatpush.msrb.mxu0 %v2162_v0  ;;  %648 = vmatpush.msra.mxu3 %v2176_v5 }
  0x1a   :  { %194 = vmatpush.msra.mxu2 %v2184_v6 }
  0x1b   :  { %301 = vmatpush.msrb.mxu0 %v2167_v2  ;;  %195 = vmatmul.f32.vlgmr.msra.gmra.mxu2 %v2079_v7 }
  0x1c   :  { %649 = vmatpush.msra.mxu3 %v2184_v6  ;;  %530 = vmatpush.msrb.mxu2 %v2162_v0 }
  0x1d   :  { %302 = vmatpush.msrb.mxu0 %v2176_v5 }
  0x1e   :  { %531 = vmatpush.msrb.mxu2 %v2167_v2 }
  0x1f   :  { %303 = vmatpush.msrb.mxu0 %v2184_v6 }
  0x20   :  { %1697 = vmatmul.msk.f32.gmra.mxu0 %vm105_vm0, %v98_v8  ;;  %532 = vmatpush.msrb.mxu2 %v2176_v5 }
  0x21   :  { %762 = vmatpush.msra.mxu0 %v2162_v0 }
  0x22   :  { %533 = vmatpush.msrb.mxu2 %v2184_v6 }
  0x23   :  { %763 = vmatpush.msra.mxu0 %v2167_v2 }
  0x24   :  { %994 = vmatpush.msra.mxu2 %v2162_v0 }
  0x25   :  { %764 = vmatpush.msra.mxu0 %v2176_v5 }
  0x26   :  { %995 = vmatpush.msra.mxu2 %v2167_v2 }
  0x27   :  { %765 = vmatpush.msra.mxu0 %v2184_v6 }
  0x28   :  { %996 = vmatpush.msra.mxu2 %v2176_v5 }
  0x2a   :  { %997 = vmatpush.msra.mxu2 %v2184_v6 }
  0x95   :  { %v129_v9 = vpop.f32.mrf.mxu0 }
  0x96   :  { %v2217_v16 = vadd.f32 %v1750_v10, %v129_v9 }
  0x9d   :  { %v132_v11 = vpop.f32.mrf.mxu0 }
  0x9e   :  { %v2214_v12 = vadd.f32 %v1750_v10, %v132_v11  ;;  %v196_v13 = vpop.f32.mrf.mxu2 }
  0x9f   :  { %v200_v14 = vrot.slane %v196_v13, 1  ;;  %v203_v17 = vadd.f32 %v196_v13, %v2217_v16 }
  0xa1   :  { %v204_v15 = vadd.f32 %v200_v14, %v2214_v12  ;;  %v1699_v21 = vmul.f32 -1.442695, %v203_v17 }
  0xa3   :  { %1753 = vtanh.f32 %v204_v15  ;;  %v1700_v20 = vmul.f32 -1.442695, %v204_v15 }
  0xa4   :  { %1755 = vtanh.f32 %v203_v17 }
  0xa5   :  { %1757 = vpow2.f32 %v1700_v20 }
  0xa6   :  { %1759 = vpow2.f32 %v1699_v21 }
  0xa9   :  { %v1754_v18 = vpop.eup %1753 }
  0xaa   :  { %251 = vrot.lane.b32.xlu0 %v1754_v18, %s2080_s4  ;;  %v1756_v19 = vpop.eup %1755 }
  0xab   :  { %v1758_v22 = vpop.eup %1757 }
  0xac   :  { %v212_v23 = vadd.f32 1.0, %v1758_v22  ;;  %v1760_v24 = vpop.eup %1759 }
  0xad   :  { %v211_v25 = vadd.f32 1.0, %v1760_v24 }
  0xae   :  { %1761 = vrcp.f32 %v212_v23  ;;  %v239_v34 = vand.u32 2147483648, %v212_v23  ;;  %vm233_vm2 = vweird.f32 %v212_v23  ;;  %v237_v35 = vand.u32 2147483647, %v212_v23 }
  0xaf   :  { %1763 = vrcp.f32 %v211_v25  ;;  %v224_v43 = vand.u32 2147483648, %v211_v25  ;;  %vm218_vm6 = vweird.f32 %v211_v25  ;;  %v222_v44 = vand.u32 2147483647, %v211_v25 }
  0xb0   :  { %v240_v38 = vor.u32 1.1754944e-38, %v239_v34  ;;  %vm238_vm4 = vcmp.eq.f32.partialorder %v237_v35, 8.507059e+37 }
  0xb1   :  { %v225_v46 = vor.u32 1.1754944e-38, %v224_v43  ;;  %vm223_vm8 = vcmp.eq.f32.partialorder %v222_v44, 8.507059e+37 }
  0xb2   :  { %249 = vrot.lane.b32.xlu0 %v1756_v19, %s2080_s4 }
  0xb4   :  { %v1762_v26 = vpop.eup %1761 }
  0xb5   :  { %v229_v27 = vmul.f32 %v1762_v26, %v212_v23  ;;  %v1764_v29 = vpop.eup %1763  ;;  %vm234_vm1 = vweird.f32 %v1762_v26 }
  0xb6   :  { %v214_v31 = vmul.f32 %v1764_v29, %v211_v25  ;;  %vm235_vm3 = vmor %vm233_vm2, %vm234_vm1  ;;  %vm219_vm5 = vweird.f32 %v1764_v29 }
  0xb7   :  { %v230_v28 = vsub.f32 1.0, %v229_v27  ;;  %vm220_vm7 = vmor %vm218_vm6, %vm219_vm5 }
  0xb8   :  { %v215_v33 = vsub.f32 1.0, %v214_v31 }
  0xb9   :  { %v231_v30 = vmul.f32 %v1762_v26, %v230_v28 }
  0xba   :  { %v216_v37 = vmul.f32 %v1764_v29, %v215_v33 }
  0xbb   :  { %v232_v32 = vadd.f32 %v1762_v26, %v231_v30 }
  0xbc   :  { %v217_v42 = vadd.f32 %v1764_v29, %v216_v37 }
  0xbd   :  { %v236_v36 = vsel %vm235_vm3, %v1762_v26, %v232_v32 }
  0xbe   :  { %v241_v40 = vsel %vm238_vm4, %v240_v38, %v236_v36  ;;  %v221_v45 = vsel %vm220_vm7, %v1764_v29, %v217_v42 }
  0xbf   :  { %v226_v48 = vsel %vm223_vm8, %v225_v46, %v221_v45  ;;  %v246_v50 = vmul.f32 0.0, %v241_v40 }
  0xc0   :  { %v245_v53 = vmul.f32 0.0, %v226_v48 }
 0x11c   :  { %v252_v39 = vpop.permute.xlu0 %251 }
 0x11d   :  { %v256_v41 = vmul.f32 %v252_v39, %v241_v40 }
 0x11f   :  { %261 = vrot.lane.b32.xlu1 %v256_v41, %s2081_s3 }
 0x124   :  { %v250_v47 = vpop.permute.xlu0 %249 }
 0x125   :  { %v255_v49 = vmul.f32 %v250_v47, %v226_v48 }
 0x127   :  { %259 = vrot.lane.b32.xlu1 %v255_v49, %s2081_s3 }
 0x191   :  { %v262_v51 = vpop.permute.xlu1 %261 }
 0x192   :  { %v2224_v52 = vadd.f32 %v262_v51, %v246_v50 }
 0x194   :  { %1765 = vtanh.f32 %v2224_v52  ;;  %v357_v43 = vrot.slane %v2224_v52, 7  ;;  %v139_v52 = vld [vmem:[#allocation8 + $0x18] sm:$0xff] }
 0x195   :  { %160 = vmatpush.msra.mxu1 %v139_v52 }
 0x199   :  { %v260_v54 = vpop.permute.xlu1 %259 }
 0x19a   :  { %v1766_v55 = vpop.eup %1765  ;;  %v2227_v56 = vadd.f32 %v260_v54, %v245_v53  ;;  %v138_v54 = vld [vmem:[#allocation8 + $0x10] sm:$0xff] }
 0x19b   :  { %273 = vrot.lane.b32.xlu2 %v1766_v55, %s2080_s4  ;;  %v137_v55 = vld [vmem:[#allocation8 + $0x8] sm:$0xff]  ;;  %161 = vmatpush.msra.mxu1 %v138_v54 }
 0x19c   :  { %1767 = vtanh.f32 %v2227_v56 }
 0x19d   :  { %162 = vmatpush.msra.mxu1 %v137_v55 }
 0x1a2   :  { %v1768_v57 = vpop.eup %1767 }
 0x1a3   :  { %271 = vrot.lane.b32.xlu2 %v1768_v57, %s2080_s4  ;;  %v136_v57 = vld [vmem:[#allocation8] sm:$0xff] }
 0x1a4   :  { %163 = vmatpush.msra.mxu1 %v136_v57 }
 0x1a6   :  { %414 = vmatpush.msrb.mxu1 %v2162_v0 }
 0x1a8   :  { %415 = vmatpush.msrb.mxu1 %v2167_v2 }
 0x1aa   :  { %416 = vmatpush.msrb.mxu1 %v2176_v5 }
 0x1ac   :  { %417 = vmatpush.msrb.mxu1 %v2184_v6 }
 0x1f5   :  { %v274_v58 = vpop.permute.xlu2 %273 }
 0x1f6   :  { %v278_v59 = vmul.f32 %v274_v58, %v241_v40  ;;  %v135_v58 = vld [vmem:[#allocation6] sm:$0xff] }
 0x1f7   :  { %1698 = vmatmul.msk.f32.vlgmr.msra.gmra.mxu1 %vm144_vm10, %v135_v58 }
 0x1f8   :  { %v281_v61 = vrot.slane %v278_v59, 7  ;;  %878 = vmatpush.msra.mxu1 %v2162_v0 }
 0x1fa   :  { %879 = vmatpush.msra.mxu1 %v2167_v2 }
 0x1fc   :  { %880 = vmatpush.msra.mxu1 %v2176_v5 }
 0x1fd   :  { %v272_v60 = vpop.permute.xlu2 %271 }
 0x1fe   :  { %v277_v62 = vmul.f32 %v272_v60, %v226_v48  ;;  %v356_v48 = vrot.slane %v2227_v56, 7  ;;  %881 = vmatpush.msra.mxu1 %v2184_v6 }
 0x200   :  { %v283_v63 = vsel %vm282_vm9, %v281_v61, %v277_v62 }
 0x201   :  { %284 = vrot.lane.b32.xlu0 %v283_v63, %s2081_s3 }
 0x273   :  { %v285_v1 = vpop.permute.xlu0 %284 }
 0x274   :  { %1701 = vmatmul.msk.f32.vlgmr.msrb.gmra.mxu0 %vm144_vm10, %v285_v1 }
 0x2f1   :  { %v305_v3 = vpop.f32.mrf.mxu0 }
 0x2f2   :  { %v309_v4 = vrot.slane %v305_v3, 7  ;;  %v313_v7 = vadd.f32 %v305_v3, %v2214_v12  ;;  %v2263_v3 = vpop.f32.mrf.mxu1 }
 0x2f4   :  { %v312_v8 = vadd.f32 %v309_v4, %v2217_v16  ;;  %1769 = vtanh.f32 %v313_v7  ;;  %v1703_v11 = vmul.f32 -1.442695, %v313_v7 }
 0x2f6   :  { %1771 = vtanh.f32 %v312_v8  ;;  %v1702_v18 = vmul.f32 -1.442695, %v312_v8 }
 0x2f7   :  { %1773 = vpow2.f32 %v1703_v11 }
 0x2fa   :  { %v1770_v9 = vpop.eup %1769 }
 0x2fb   :  { %366 = vrot.lane.b32.xlu2 %v1770_v9, %s2080_s4 }
 0x2fc   :  { %v1772_v10 = vpop.eup %1771 }
 0x2fd   :  { %364 = vrot.lane.b32.xlu1 %v1772_v10, %s2080_s4  ;;  %v1774_v13 = vpop.eup %1773 }
 0x2fe   :  { %v321_v14 = vadd.f32 1.0, %v1774_v13 }
 0x300   :  { %1775 = vrcp.f32 %v321_v14  ;;  %v348_v23 = vand.u32 2147483648, %v321_v14  ;;  %vm342_vm12 = vweird.f32 %v321_v14  ;;  %v346_v25 = vand.u32 2147483647, %v321_v14 }
 0x301   :  { %1777 = vpow2.f32 %v1702_v18 }
 0x302   :  { %v349_v27 = vor.u32 1.1754944e-38, %v348_v23  ;;  %vm347_vm14 = vcmp.eq.f32.partialorder %v346_v25, 8.507059e+37 }
 0x306   :  { %v1776_v15 = vpop.eup %1775 }
 0x307   :  { %v338_v17 = vmul.f32 %v1776_v15, %v321_v14  ;;  %v1778_v21 = vpop.eup %1777  ;;  %vm343_vm11 = vweird.f32 %v1776_v15 }
 0x308   :  { %v320_v24 = vadd.f32 1.0, %v1778_v21  ;;  %vm344_vm13 = vmor %vm342_vm12, %vm343_vm11 }
 0x309   :  { %v339_v19 = vsub.f32 1.0, %v338_v17 }
 0x30a   :  { %1779 = vrcp.f32 %v320_v24  ;;  %v333_v36 = vand.u32 2147483648, %v320_v24  ;;  %vm327_vm1 = vweird.f32 %v320_v24  ;;  %v331_v37 = vand.u32 2147483647, %v320_v24 }
 0x30b   :  { %v340_v20 = vmul.f32 %v1776_v15, %v339_v19 }
 0x30c   :  { %v334_v39 = vor.u32 1.1754944e-38, %v333_v36  ;;  %vm332_vm3 = vcmp.eq.f32.partialorder %v331_v37, 8.507059e+37 }
 0x30d   :  { %v341_v22 = vadd.f32 %v1776_v15, %v340_v20 }
 0x30f   :  { %v345_v26 = vsel %vm344_vm13, %v1776_v15, %v341_v22 }
 0x310   :  { %v350_v29 = vsel %vm347_vm14, %v349_v27, %v345_v26  ;;  %v1780_v31 = vpop.eup %1779 }
 0x311   :  { %v323_v32 = vmul.f32 %v1780_v31, %v320_v24  ;;  %vm328_vm15 = vweird.f32 %v1780_v31  ;;  %v361_v44 = vmul.f32 %v357_v43, %v350_v29 }
 0x312   :  { %vm329_vm2 = vmor %vm327_vm1, %vm328_vm15 }
 0x313   :  { %v324_v33 = vsub.f32 1.0, %v323_v32 }
 0x315   :  { %v325_v34 = vmul.f32 %v1780_v31, %v324_v33 }
 0x317   :  { %v326_v35 = vadd.f32 %v1780_v31, %v325_v34 }
 0x319   :  { %v330_v38 = vsel %vm329_vm2, %v1780_v31, %v326_v35 }
 0x31a   :  { %v335_v41 = vsel %vm332_vm3, %v334_v39, %v330_v38 }
 0x31b   :  { %v360_v49 = vmul.f32 %v356_v48, %v335_v41 }
 0x355   :  { %v367_v28 = vpop.permute.xlu2 %366 }
 0x356   :  { %v371_v30 = vmul.f32 %v367_v28, %v350_v29 }
 0x358   :  { %376 = vrot.lane.b32.xlu1 %v371_v30, %s2081_s3 }
 0x36f   :  { %v365_v40 = vpop.permute.xlu1 %364 }
 0x370   :  { %v370_v42 = vmul.f32 %v365_v40, %v335_v41 }
 0x372   :  { %374 = vrot.lane.b32.xlu0 %v370_v42, %s2081_s3 }
 0x3ca   :  { %v377_v45 = vpop.permute.xlu1 %376 }
 0x3cb   :  { %v2242_v46 = vadd.f32 %v377_v45, %v361_v44 }
 0x3cd   :  { %1781 = vtanh.f32 %v2242_v46  ;;  %v472_v42 = vrot.slane %v2242_v46, 7 }
 0x3d3   :  { %v1782_v47 = vpop.eup %1781 }
 0x3d4   :  { %388 = vrot.lane.b32.xlu0 %v1782_v47, %s2080_s4 }
 0x3e4   :  { %v375_v50 = vpop.permute.xlu0 %374 }
 0x3e5   :  { %v2247_v51 = vadd.f32 %v375_v50, %v360_v49 }
 0x3e7   :  { %1783 = vtanh.f32 %v2247_v51 }
 0x3ed   :  { %v1784_v53 = vpop.eup %1783 }
 0x3ee   :  { %386 = vrot.lane.b32.xlu2 %v1784_v53, %s2080_s4 }
 0x446   :  { %v389_v56 = vpop.permute.xlu0 %388 }
 0x447   :  { %v393_v61 = vmul.f32 %v389_v56, %v350_v29 }
 0x448   :  { %v387_v59 = vpop.permute.xlu2 %386 }
 0x449   :  { %v392_v60 = vmul.f32 %v387_v59, %v335_v41  ;;  %v471_v41 = vrot.slane %v2247_v51, 7 }
 0x44b   :  { %v396_v62 = vrot.slane %v392_v60, 1 }
 0x44d   :  { %v397_v63 = vsel %vm282_vm9, %v393_v61, %v396_v62 }
 0x44e   :  { %398 = vrot.lane.b32.xlu1 %v397_v63, %s2081_s3 }
 0x4c0   :  { %v399_v1 = vpop.permute.xlu1 %398 }
 0x4c1   :  { %1704 = vmatmul.msk.f32.vlgmr.msrb.gmra.mxu1 %vm144_vm10, %v399_v1 }
 0x53e   :  { %v419_v0 = vpop.f32.mrf.mxu1 }
 0x53f   :  { %v423_v2 = vrot.slane %v419_v0, 6  ;;  %v424_v4 = vrot.slane %v419_v0, 7 }
 0x541   :  { %v427_v5 = vadd.f32 %v423_v2, %v2217_v16  ;;  %v428_v6 = vadd.f32 %v424_v4, %v2214_v12 }
 0x543   :  { %1785 = vtanh.f32 %v427_v5  ;;  %v1705_v9 = vmul.f32 -1.442695, %v427_v5  ;;  %v1706_v14 = vmul.f32 -1.442695, %v428_v6 }
 0x544   :  { %1787 = vtanh.f32 %v428_v6 }
 0x545   :  { %1789 = vpow2.f32 %v1705_v9 }
 0x549   :  { %v1786_v7 = vpop.eup %1785 }
 0x54a   :  { %v1788_v8 = vpop.eup %1787  ;;  %479 = vrot.lane.b32.xlu2 %v1786_v7, %s2080_s4 }
 0x54b   :  { %481 = vrot.lane.b32.xlu0 %v1788_v8, %s2080_s4  ;;  %v1790_v10 = vpop.eup %1789 }
 0x54c   :  { %v435_v11 = vadd.f32 1.0, %v1790_v10 }
 0x54e   :  { %1791 = vrcp.f32 %v435_v11  ;;  %v448_v22 = vand.u32 2147483648, %v435_v11  ;;  %vm442_vm5 = vweird.f32 %v435_v11  ;;  %v446_v23 = vand.u32 2147483647, %v435_v11 }
 0x54f   :  { %1793 = vpow2.f32 %v1706_v14 }
 0x550   :  { %v449_v25 = vor.u32 1.1754944e-38, %v448_v22  ;;  %vm447_vm7 = vcmp.eq.f32.partialorder %v446_v23, 8.507059e+37 }
 0x554   :  { %v1792_v13 = vpop.eup %1791 }
 0x555   :  { %v438_v15 = vmul.f32 %v1792_v13, %v435_v11  ;;  %v1794_v19 = vpop.eup %1793  ;;  %vm443_vm4 = vweird.f32 %v1792_v13 }
 0x556   :  { %v436_v20 = vadd.f32 1.0, %v1794_v19  ;;  %vm444_vm6 = vmor %vm442_vm5, %vm443_vm4 }
 0x557   :  { %v439_v17 = vsub.f32 1.0, %v438_v15 }
 0x558   :  { %1795 = vrcp.f32 %v436_v20  ;;  %v463_v34 = vand.u32 2147483648, %v436_v20  ;;  %vm457_vm11 = vweird.f32 %v436_v20  ;;  %v461_v35 = vand.u32 2147483647, %v436_v20 }
 0x559   :  { %v440_v18 = vmul.f32 %v1792_v13, %v439_v17 }
 0x55a   :  { %v464_v37 = vor.u32 1.1754944e-38, %v463_v34  ;;  %vm462_vm13 = vcmp.eq.f32.partialorder %v461_v35, 8.507059e+37 }
 0x55b   :  { %v441_v21 = vadd.f32 %v1792_v13, %v440_v18 }
 0x55d   :  { %v445_v24 = vsel %vm444_vm6, %v1792_v13, %v441_v21 }
 0x55e   :  { %v450_v27 = vsel %vm447_vm7, %v449_v25, %v445_v24  ;;  %v1796_v29 = vpop.eup %1795 }
 0x55f   :  { %v453_v30 = vmul.f32 %v1796_v29, %v436_v20  ;;  %vm458_vm8 = vweird.f32 %v1796_v29  ;;  %v475_v43 = vmul.f32 %v471_v41, %v450_v27 }
 0x560   :  { %vm459_vm12 = vmor %vm457_vm11, %vm458_vm8 }
 0x561   :  { %v454_v31 = vsub.f32 1.0, %v453_v30 }
 0x563   :  { %v455_v32 = vmul.f32 %v1796_v29, %v454_v31 }
 0x565   :  { %v456_v33 = vadd.f32 %v1796_v29, %v455_v32 }
 0x567   :  { %v460_v36 = vsel %vm459_vm12, %v1796_v29, %v456_v33 }
 0x568   :  { %v465_v39 = vsel %vm462_vm13, %v464_v37, %v460_v36 }
 0x569   :  { %v476_v44 = vmul.f32 %v472_v42, %v465_v39 }
 0x5a4   :  { %v480_v26 = vpop.permute.xlu2 %479 }
 0x5a5   :  { %v485_v28 = vmul.f32 %v480_v26, %v450_v27 }
 0x5a7   :  { %489 = vrot.lane.b32.xlu1 %v485_v28, %s2081_s3 }
 0x5bd   :  { %v482_v38 = vpop.permute.xlu0 %481 }
 0x5be   :  { %v486_v40 = vmul.f32 %v482_v38, %v465_v39 }
 0x5c0   :  { %491 = vrot.lane.b32.xlu2 %v486_v40, %s2081_s3 }
 0x619   :  { %v490_v45 = vpop.permute.xlu1 %489 }
 0x61a   :  { %v492_v47 = vpop.permute.xlu2 %491  ;;  %v2273_v48 = vadd.f32 %v490_v45, %v475_v43 }
 0x61b   :  { %v2275_v49 = vadd.f32 %v492_v47, %v476_v44 }
 0x61c   :  { %1797 = vtanh.f32 %v2273_v48  ;;  %v587_v35 = vrot.slane %v2273_v48, 7 }
 0x61d   :  { %1799 = vtanh.f32 %v2275_v49  ;;  %v588_v40 = vrot.slane %v2275_v49, 7 }
 0x622   :  { %v1798_v50 = vpop.eup %1797 }
 0x623   :  { %v1800_v53 = vpop.eup %1799  ;;  %501 = vrot.lane.b32.xlu0 %v1798_v50, %s2080_s4 }
 0x624   :  { %503 = vrot.lane.b32.xlu1 %v1800_v53, %s2080_s4 }
 0x695   :  { %v502_v51 = vpop.permute.xlu0 %501 }
 0x696   :  { %v504_v46 = vpop.permute.xlu1 %503  ;;  %v507_v52 = vmul.f32 %v502_v51, %v450_v27 }
 0x697   :  { %v508_v54 = vmul.f32 %v504_v46, %v465_v39 }
 0x698   :  { %v511_v55 = vrot.slane %v507_v52, 2 }
 0x699   :  { %v512_v57 = vrot.slane %v508_v54, 1 }
 0x69b   :  { %v513_v58 = vsel %vm282_vm9, %v512_v57, %v511_v55 }
 0x69c   :  { %514 = vrot.lane.b32.xlu2 %v513_v58, %s2081_s3 }
 0x6f6   :  { %v515_v56 = vpop.permute.xlu2 %514 }
 0x6f7   :  { %1707 = vmatmul.msk.f32.vlgmr.msrb.gmra.mxu2 %vm144_vm10, %v515_v56 }
 0x77a   :  { %v535_v59 = vpop.f32.mrf.mxu2 }
 0x77b   :  { %v539_v60 = vrot.slane %v535_v59, 5  ;;  %v540_v61 = vrot.slane %v535_v59, 6 }
 0x77d   :  { %v543_v62 = vadd.f32 %v539_v60, %v2217_v16  ;;  %v544_v63 = vadd.f32 %v540_v61, %v2214_v12 }
 0x77f   :  { %1801 = vtanh.f32 %v543_v62  ;;  %v1708_v2 = vmul.f32 -1.442695, %v543_v62  ;;  %v1709_v4 = vmul.f32 -1.442695, %v544_v63 }
 0x780   :  { %1803 = vtanh.f32 %v544_v63 }
 0x781   :  { %1805 = vpow2.f32 %v1708_v2 }
 0x782   :  { %1807 = vpow2.f32 %v1709_v4 }
 0x785   :  { %v1802_v1 = vpop.eup %1801 }
 0x786   :  { %v1804_v0 = vpop.eup %1803  ;;  %595 = vrot.lane.b32.xlu0 %v1802_v1, %s2080_s4 }
 0x787   :  { %597 = vrot.lane.b32.xlu1 %v1804_v0, %s2080_s4  ;;  %v1806_v5 = vpop.eup %1805 }
 0x788   :  { %v1808_v6 = vpop.eup %1807  ;;  %v551_v7 = vadd.f32 1.0, %v1806_v5 }
 0x789   :  { %v552_v8 = vadd.f32 1.0, %v1808_v6 }
 0x78a   :  { %1809 = vrcp.f32 %v551_v7  ;;  %v564_v21 = vand.u32 2147483648, %v551_v7  ;;  %vm558_vm1 = vweird.f32 %v551_v7  ;;  %v562_v23 = vand.u32 2147483647, %v551_v7 }
 0x78b   :  { %1811 = vrcp.f32 %v552_v8  ;;  %v579_v22 = vand.u32 2147483648, %v552_v8  ;;  %vm573_vm2 = vweird.f32 %v552_v8  ;;  %v577_v24 = vand.u32 2147483647, %v552_v8 }
 0x78c   :  { %v565_v27 = vor.u32 1.1754944e-38, %v564_v21  ;;  %vm563_vm5 = vcmp.eq.f32.partialorder %v562_v23, 8.507059e+37 }
 0x78d   :  { %v580_v28 = vor.u32 1.1754944e-38, %v579_v22  ;;  %vm578_vm6 = vcmp.eq.f32.partialorder %v577_v24, 8.507059e+37 }
 0x790   :  { %v1810_v9 = vpop.eup %1809 }
 0x791   :  { %v1812_v10 = vpop.eup %1811  ;;  %v554_v11 = vmul.f32 %v1810_v9, %v551_v7  ;;  %vm559_vm14 = vweird.f32 %v1810_v9 }
 0x792   :  { %v569_v13 = vmul.f32 %v1812_v10, %v552_v8  ;;  %vm574_vm15 = vweird.f32 %v1812_v10  ;;  %vm560_vm3 = vmor %vm558_vm1, %vm559_vm14 }
 0x793   :  { %v555_v14 = vsub.f32 1.0, %v554_v11  ;;  %vm575_vm4 = vmor %vm573_vm2, %vm574_vm15 }
 0x794   :  { %v570_v15 = vsub.f32 1.0, %v569_v13 }
 0x795   :  { %v556_v17 = vmul.f32 %v1810_v9, %v555_v14 }
 0x796   :  { %v571_v18 = vmul.f32 %v1812_v10, %v570_v15 }
 0x797   :  { %v557_v19 = vadd.f32 %v1810_v9, %v556_v17 }
 0x798   :  { %v572_v20 = vadd.f32 %v1812_v10, %v571_v18 }
 0x799   :  { %v561_v25 = vsel %vm560_vm3, %v1810_v9, %v557_v19 }
 0x79a   :  { %v576_v26 = vsel %vm575_vm4, %v1812_v10, %v572_v20  ;;  %v566_v30 = vsel %vm563_vm5, %v565_v27, %v561_v25 }
 0x79b   :  { %v581_v32 = vsel %vm578_vm6, %v580_v28, %v576_v26  ;;  %v591_v36 = vmul.f32 %v587_v35, %v566_v30 }
 0x79c   :  { %v592_v41 = vmul.f32 %v588_v40, %v581_v32 }
 0x7f8   :  { %v596_v29 = vpop.permute.xlu0 %595 }
 0x7f9   :  { %v598_v31 = vpop.permute.xlu1 %597  ;;  %v601_v33 = vmul.f32 %v596_v29, %v566_v30 }
 0x7fa   :  { %v602_v34 = vmul.f32 %v598_v31, %v581_v32 }
 0x7fb   :  { %605 = vrot.lane.b32.xlu2 %v601_v33, %s2081_s3 }
 0x7fc   :  { %607 = vrot.lane.b32.xlu0 %v602_v34, %s2081_s3 }
 0x855   :  { %v606_v37 = vpop.permute.xlu2 %605 }
 0x856   :  { %v2291_v38 = vadd.f32 %v606_v37, %v591_v36 }
 0x858   :  { %1813 = vtanh.f32 %v2291_v38  ;;  %v703_v34 = vrot.slane %v2291_v38, 7 }
 0x85e   :  { %v1814_v39 = vpop.eup %1813 }
 0x85f   :  { %617 = vrot.lane.b32.xlu1 %v1814_v39, %s2080_s4 }
 0x86e   :  { %v608_v42 = vpop.permute.xlu0 %607 }
 0x86f   :  { %v2296_v43 = vadd.f32 %v608_v42, %v592_v41 }
 0x871   :  { %1815 = vtanh.f32 %v2296_v43  ;;  %v704_v29 = vrot.slane %v2296_v43, 7 }
 0x877   :  { %v1816_v44 = vpop.eup %1815 }
 0x878   :  { %619 = vrot.lane.b32.xlu2 %v1816_v44, %s2080_s4 }
 0x8d1   :  { %v618_v45 = vpop.permute.xlu1 %617 }
 0x8d2   :  { %v620_v47 = vpop.permute.xlu2 %619  ;;  %v623_v48 = vmul.f32 %v618_v45, %v566_v30 }
 0x8d3   :  { %v624_v50 = vmul.f32 %v620_v47, %v581_v32 }
 0x8d4   :  { %v627_v53 = vrot.slane %v623_v48, 3 }
 0x8d5   :  { %v628_v51 = vrot.slane %v624_v50, 2 }
 0x8d7   :  { %v629_v46 = vsel %vm282_vm9, %v628_v51, %v627_v53 }
 0x8d8   :  { %630 = vrot.lane.b32.xlu0 %v629_v46, %s2081_s3 }
 0x94a   :  { %v631_v49 = vpop.permute.xlu0 %630 }
 0x94b   :  { %1710 = vmatmul.msk.f32.vlgmr.msra.gmra.mxu3 %vm144_vm10, %v631_v49 }
 0x9ce   :  { %v651_v52 = vpop.f32.mrf.mxu3 }
 0x9cf   :  { %v655_v54 = vrot.slane %v651_v52, 4  ;;  %v656_v55 = vrot.slane %v651_v52, 5 }
 0x9d1   :  { %v659_v57 = vadd.f32 %v655_v54, %v2217_v16  ;;  %v660_v58 = vadd.f32 %v656_v55, %v2214_v12 }
 0x9d3   :  { %1817 = vtanh.f32 %v659_v57  ;;  %v1712_v60 = vmul.f32 -1.442695, %v660_v58  ;;  %v1711_v1 = vmul.f32 -1.442695, %v659_v57 }
 0x9d4   :  { %1819 = vtanh.f32 %v660_v58 }
 0x9d5   :  { %1821 = vpow2.f32 %v1712_v60 }
 0x9d9   :  { %v1818_v56 = vpop.eup %1817 }
 0x9da   :  { %v1820_v59 = vpop.eup %1819  ;;  %711 = vrot.lane.b32.xlu1 %v1818_v56, %s2080_s4 }
 0x9db   :  { %713 = vrot.lane.b32.xlu2 %v1820_v59, %s2080_s4  ;;  %v1822_v61 = vpop.eup %1821 }
 0x9dc   :  { %v668_v62 = vadd.f32 1.0, %v1822_v61 }
 0x9de   :  { %1823 = vrcp.f32 %v668_v62  ;;  %v695_v8 = vand.u32 2147483648, %v668_v62  ;;  %vm689_vm8 = vweird.f32 %v668_v62  ;;  %v693_v9 = vand.u32 2147483647, %v668_v62 }
 0x9df   :  { %1825 = vpow2.f32 %v1711_v1 }
 0x9e0   :  { %v696_v11 = vor.u32 1.1754944e-38, %v695_v8  ;;  %vm694_vm12 = vcmp.eq.f32.partialorder %v693_v9, 8.507059e+37 }
 0x9e4   :  { %v1824_v63 = vpop.eup %1823 }
 0x9e5   :  { %v685_v0 = vmul.f32 %v1824_v63, %v668_v62  ;;  %v1826_v4 = vpop.eup %1825  ;;  %vm690_vm7 = vweird.f32 %v1824_v63 }
 0x9e6   :  { %v667_v6 = vadd.f32 1.0, %v1826_v4  ;;  %vm691_vm11 = vmor %vm689_vm8, %vm690_vm7 }
 0x9e7   :  { %v686_v2 = vsub.f32 1.0, %v685_v0 }
 0x9e8   :  { %1827 = vrcp.f32 %v667_v6  ;;  %v680_v22 = vand.u32 2147483648, %v667_v6  ;;  %vm674_vm14 = vweird.f32 %v667_v6  ;;  %v678_v23 = vand.u32 2147483647, %v667_v6 }
 0x9e9   :  { %v687_v5 = vmul.f32 %v1824_v63, %v686_v2 }
 0x9ea   :  { %v681_v25 = vor.u32 1.1754944e-38, %v680_v22  ;;  %vm679_vm1 = vcmp.eq.f32.partialorder %v678_v23, 8.507059e+37 }
 0x9eb   :  { %v688_v7 = vadd.f32 %v1824_v63, %v687_v5 }
 0x9ed   :  { %v692_v10 = vsel %vm691_vm11, %v1824_v63, %v688_v7 }
 0x9ee   :  { %v697_v14 = vsel %vm694_vm12, %v696_v11, %v692_v10  ;;  %v1828_v15 = vpop.eup %1827 }
 0x9ef   :  { %v670_v18 = vmul.f32 %v1828_v15, %v667_v6  ;;  %vm675_vm13 = vweird.f32 %v1828_v15  ;;  %v708_v30 = vmul.f32 %v704_v29, %v697_v14 }
 0x9f0   :  { %vm676_vm15 = vmor %vm674_vm14, %vm675_vm13 }
 0x9f1   :  { %v671_v19 = vsub.f32 1.0, %v670_v18 }
 0x9f3   :  { %v672_v20 = vmul.f32 %v1828_v15, %v671_v19 }
 0x9f5   :  { %v673_v21 = vadd.f32 %v1828_v15, %v672_v20 }
 0x9f7   :  { %v677_v24 = vsel %vm676_vm15, %v1828_v15, %v673_v21 }
 0x9f8   :  { %v682_v27 = vsel %vm679_vm1, %v681_v25, %v677_v24 }
 0x9f9   :  { %v707_v35 = vmul.f32 %v703_v34, %v682_v27 }
 0xa35   :  { %v714_v13 = vpop.permute.xlu2 %713 }
 0xa36   :  { %v718_v17 = vmul.f32 %v714_v13, %v697_v14 }
 0xa38   :  { %723 = vrot.lane.b32.xlu1 %v718_v17, %s2081_s3 }
 0xa4c   :  { %v712_v26 = vpop.permute.xlu1 %711 }
 0xa4d   :  { %v717_v28 = vmul.f32 %v712_v26, %v682_v27 }
 0xa4f   :  { %721 = vrot.lane.b32.xlu0 %v717_v28, %s2081_s3 }
 0xaaa   :  { %v724_v31 = vpop.permute.xlu1 %723 }
 0xaab   :  { %v2310_v32 = vadd.f32 %v724_v31, %v708_v30 }
 0xaad   :  { %1829 = vtanh.f32 %v2310_v32  ;;  %v820_v24 = vrot.slane %v2310_v32, 7 }
 0xab3   :  { %v1830_v33 = vpop.eup %1829 }
 0xab4   :  { %735 = vrot.lane.b32.xlu0 %v1830_v33, %s2080_s4 }
 0xac1   :  { %v722_v36 = vpop.permute.xlu0 %721 }
 0xac2   :  { %v2315_v37 = vadd.f32 %v722_v36, %v707_v35 }
 0xac4   :  { %1831 = vtanh.f32 %v2315_v37  ;;  %v819_v23 = vrot.slane %v2315_v37, 7 }
 0xaca   :  { %v1832_v39 = vpop.eup %1831 }
 0xacb   :  { %733 = vrot.lane.b32.xlu2 %v1832_v39, %s2080_s4 }
 0xb25   :  { %v734_v40 = vpop.permute.xlu2 %733 }
 0xb26   :  { %v736_v41 = vpop.permute.xlu0 %735  ;;  %v739_v42 = vmul.f32 %v734_v40, %v682_v27 }
 0xb27   :  { %v740_v43 = vmul.f32 %v736_v41, %v697_v14 }
 0xb28   :  { %v743_v44 = vrot.slane %v739_v42, 4 }
 0xb29   :  { %v744_v45 = vrot.slane %v740_v43, 3 }
 0xb2b   :  { %v745_v47 = vsel %vm282_vm9, %v744_v45, %v743_v44 }
 0xb2c   :  { %746 = vrot.lane.b32.xlu1 %v745_v47, %s2081_s3 }
 0xb9e   :  { %v747_v38 = vpop.permute.xlu1 %746 }
 0xb9f   :  { %1713 = vmatmul.msk.f32.vlgmr.msra.gmra.mxu0 %vm144_vm10, %v747_v38 }
 0xc1c   :  { %v767_v48 = vpop.f32.mrf.mxu0 }
 0xc1d   :  { %v771_v50 = vrot.slane %v767_v48, 3  ;;  %v772_v53 = vrot.slane %v767_v48, 4 }
 0xc1f   :  { %v775_v51 = vadd.f32 %v771_v50, %v2217_v16  ;;  %v776_v46 = vadd.f32 %v772_v53, %v2214_v12 }
 0xc21   :  { %1833 = vtanh.f32 %v775_v51  ;;  %v1714_v54 = vmul.f32 -1.442695, %v775_v51  ;;  %v1715_v56 = vmul.f32 -1.442695, %v776_v46 }
 0xc22   :  { %1835 = vtanh.f32 %v776_v46 }
 0xc23   :  { %1837 = vpow2.f32 %v1714_v54 }
 0xc27   :  { %v1834_v49 = vpop.eup %1833 }
 0xc28   :  { %v1836_v52 = vpop.eup %1835  ;;  %827 = vrot.lane.b32.xlu2 %v1834_v49, %s2080_s4 }
 0xc29   :  { %829 = vrot.lane.b32.xlu0 %v1836_v52, %s2080_s4  ;;  %v1838_v55 = vpop.eup %1837 }
 0xc2a   :  { %v783_v57 = vadd.f32 1.0, %v1838_v55 }
 0xc2c   :  { %1839 = vrcp.f32 %v783_v57  ;;  %v796_v0 = vand.u32 2147483648, %v783_v57  ;;  %vm790_vm3 = vweird.f32 %v783_v57  ;;  %v794_v2 = vand.u32 2147483647, %v783_v57 }
 0xc2d   :  { %1841 = vpow2.f32 %v1715_v56 }
 0xc2e   :  { %v797_v5 = vor.u32 1.1754944e-38, %v796_v0  ;;  %vm795_vm5 = vcmp.eq.f32.partialorder %v794_v2, 8.507059e+37 }
 0xc32   :  { %v1840_v58 = vpop.eup %1839 }
 0xc33   :  { %v786_v59 = vmul.f32 %v1840_v58, %v783_v57  ;;  %v1842_v62 = vpop.eup %1841  ;;  %vm791_vm2 = vweird.f32 %v1840_v58 }
 0xc34   :  { %v784_v63 = vadd.f32 1.0, %v1842_v62  ;;  %vm792_vm4 = vmor %vm790_vm3, %vm791_vm2 }
 0xc35   :  { %v787_v60 = vsub.f32 1.0, %v786_v59 }
 0xc36   :  { %1843 = vrcp.f32 %v784_v63  ;;  %v811_v15 = vand.u32 2147483648, %v784_v63  ;;  %vm805_vm7 = vweird.f32 %v784_v63  ;;  %v809_v17 = vand.u32 2147483647, %v784_v63 }
 0xc37   :  { %v788_v61 = vmul.f32 %v1840_v58, %v787_v60 }
 0xc38   :  { %v812_v19 = vor.u32 1.1754944e-38, %v811_v15  ;;  %vm810_vm11 = vcmp.eq.f32.partialorder %v809_v17, 8.507059e+37 }
 0xc39   :  { %v789_v1 = vadd.f32 %v1840_v58, %v788_v61 }
 0xc3b   :  { %v793_v4 = vsel %vm792_vm4, %v1840_v58, %v789_v1 }
 0xc3c   :  { %v798_v7 = vsel %vm795_vm5, %v797_v5, %v793_v4  ;;  %v1844_v9 = vpop.eup %1843 }
 0xc3d   :  { %v801_v10 = vmul.f32 %v1844_v9, %v784_v63  ;;  %vm806_vm6 = vweird.f32 %v1844_v9  ;;  %v823_v25 = vmul.f32 %v819_v23, %v798_v7 }
 0xc3e   :  { %vm807_vm8 = vmor %vm805_vm7, %vm806_vm6 }
 0xc3f   :  { %v802_v11 = vsub.f32 1.0, %v801_v10 }
 0xc41   :  { %v803_v13 = vmul.f32 %v1844_v9, %v802_v11 }
 0xc43   :  { %v804_v14 = vadd.f32 %v1844_v9, %v803_v13 }
 0xc45   :  { %v808_v18 = vsel %vm807_vm8, %v1844_v9, %v804_v14 }
 0xc46   :  { %v813_v21 = vsel %vm810_vm11, %v812_v19, %v808_v18 }
 0xc47   :  { %v824_v26 = vmul.f32 %v820_v24, %v813_v21 }
 0xc82   :  { %v828_v6 = vpop.permute.xlu2 %827 }
 0xc83   :  { %v833_v8 = vmul.f32 %v828_v6, %v798_v7 }
 0xc85   :  { %837 = vrot.lane.b32.xlu1 %v833_v8, %s2081_s3 }
 0xc9b   :  { %v830_v20 = vpop.permute.xlu0 %829 }
 0xc9c   :  { %v834_v22 = vmul.f32 %v830_v20, %v813_v21 }
 0xc9e   :  { %839 = vrot.lane.b32.xlu2 %v834_v22, %s2081_s3 }
 0xcf7   :  { %v838_v27 = vpop.permute.xlu1 %837 }
 0xcf8   :  { %v840_v28 = vpop.permute.xlu2 %839  ;;  %v2330_v29 = vadd.f32 %v838_v27, %v823_v25 }
 0xcf9   :  { %v2332_v30 = vadd.f32 %v840_v28, %v824_v26 }
 0xcfa   :  { %1845 = vtanh.f32 %v2330_v29  ;;  %v935_v17 = vrot.slane %v2330_v29, 7 }
 0xcfb   :  { %1847 = vtanh.f32 %v2332_v30  ;;  %v936_v22 = vrot.slane %v2332_v30, 7 }
 0xd00   :  { %v1846_v31 = vpop.eup %1845 }
 0xd01   :  { %v1848_v33 = vpop.eup %1847  ;;  %849 = vrot.lane.b32.xlu0 %v1846_v31, %s2080_s4 }
 0xd02   :  { %851 = vrot.lane.b32.xlu1 %v1848_v33, %s2080_s4 }
 0xd73   :  { %v850_v34 = vpop.permute.xlu0 %849 }
 0xd74   :  { %v852_v32 = vpop.permute.xlu1 %851  ;;  %v855_v35 = vmul.f32 %v850_v34, %v798_v7 }
 0xd75   :  { %v856_v36 = vmul.f32 %v852_v32, %v813_v21 }
 0xd76   :  { %v859_v37 = vrot.slane %v855_v35, 5 }
 0xd77   :  { %v860_v39 = vrot.slane %v856_v36, 4 }
 0xd79   :  { %v861_v40 = vsel %vm282_vm9, %v860_v39, %v859_v37 }
 0xd7a   :  { %862 = vrot.lane.b32.xlu2 %v861_v40, %s2081_s3 }
 0xdd4   :  { %v863_v41 = vpop.permute.xlu2 %862 }
 0xdd5   :  { %1716 = vmatmul.msk.f32.vlgmr.msra.gmra.mxu1 %vm144_vm10, %v863_v41 }
 0xe52   :  { %v883_v42 = vpop.f32.mrf.mxu1 }
 0xe53   :  { %v887_v43 = vrot.slane %v883_v42, 2  ;;  %v888_v44 = vrot.slane %v883_v42, 3 }
 0xe55   :  { %v891_v45 = vadd.f32 %v887_v43, %v2217_v16  ;;  %v892_v47 = vadd.f32 %v888_v44, %v2214_v12 }
 0xe57   :  { %1849 = vtanh.f32 %v891_v45  ;;  %v1717_v50 = vmul.f32 -1.442695, %v891_v45  ;;  %v1718_v53 = vmul.f32 -1.442695, %v892_v47 }
 0xe58   :  { %1851 = vtanh.f32 %v892_v47 }
 0xe59   :  { %1853 = vpow2.f32 %v1717_v50 }
 0xe5a   :  { %1855 = vpow2.f32 %v1718_v53 }
 0xe5d   :  { %v1850_v38 = vpop.eup %1849 }
 0xe5e   :  { %v1852_v48 = vpop.eup %1851  ;;  %943 = vrot.lane.b32.xlu0 %v1850_v38, %s2080_s4 }
 0xe5f   :  { %945 = vrot.lane.b32.xlu1 %v1852_v48, %s2080_s4  ;;  %v1854_v51 = vpop.eup %1853 }
 0xe60   :  { %v1856_v46 = vpop.eup %1855  ;;  %v899_v49 = vadd.f32 1.0, %v1854_v51 }
 0xe61   :  { %v900_v52 = vadd.f32 1.0, %v1856_v46 }
 0xe62   :  { %1857 = vrcp.f32 %v899_v49  ;;  %v912_v1 = vand.u32 2147483648, %v899_v49  ;;  %vm906_vm14 = vweird.f32 %v899_v49  ;;  %v910_v2 = vand.u32 2147483647, %v899_v49 }
 0xe63   :  { %1859 = vrcp.f32 %v900_v52  ;;  %v927_v0 = vand.u32 2147483648, %v900_v52  ;;  %vm921_vm15 = vweird.f32 %v900_v52  ;;  %v925_v4 = vand.u32 2147483647, %v900_v52 }
 0xe64   :  { %v913_v7 = vor.u32 1.1754944e-38, %v912_v1  ;;  %vm911_vm3 = vcmp.eq.f32.partialorder %v910_v2, 8.507059e+37 }
 0xe65   :  { %v928_v8 = vor.u32 1.1754944e-38, %v927_v0  ;;  %vm926_vm4 = vcmp.eq.f32.partialorder %v925_v4, 8.507059e+37 }
 0xe68   :  { %v1858_v54 = vpop.eup %1857 }
 0xe69   :  { %v1860_v55 = vpop.eup %1859  ;;  %v902_v57 = vmul.f32 %v1858_v54, %v899_v49  ;;  %vm907_vm12 = vweird.f32 %v1858_v54 }
 0xe6a   :  { %v917_v58 = vmul.f32 %v1860_v55, %v900_v52  ;;  %vm922_vm13 = vweird.f32 %v1860_v55  ;;  %vm908_vm1 = vmor %vm906_vm14, %vm907_vm12 }
 0xe6b   :  { %v903_v56 = vsub.f32 1.0, %v902_v57  ;;  %vm923_vm2 = vmor %vm921_vm15, %vm922_vm13 }
 0xe6c   :  { %v918_v59 = vsub.f32 1.0, %v917_v58 }
 0xe6d   :  { %v904_v60 = vmul.f32 %v1858_v54, %v903_v56 }
 0xe6e   :  { %v919_v61 = vmul.f32 %v1860_v55, %v918_v59 }
 0xe6f   :  { %v905_v62 = vadd.f32 %v1858_v54, %v904_v60 }
 0xe70   :  { %v920_v63 = vadd.f32 %v1860_v55, %v919_v61 }
 0xe71   :  { %v909_v5 = vsel %vm908_vm1, %v1858_v54, %v905_v62 }
 0xe72   :  { %v924_v6 = vsel %vm923_vm2, %v1860_v55, %v920_v63  ;;  %v914_v10 = vsel %vm911_vm3, %v913_v7, %v909_v5  ;;  %vm1161_vm3 = vcmask 253952  }
 0xe73   :  { %v929_v13 = vsel %vm926_vm4, %v928_v8, %v924_v6  ;;  %v939_v18 = vmul.f32 %v935_v17, %v914_v10  ;;  %vm1163_vm4 = vcmask 254977  }
 0xe74   :  { %v940_v23 = vmul.f32 %v936_v22, %v929_v13  ;;  %v173_v22 = vld [vmem:[#allocation9 + $0x8] sm:$0xff] }
 0xed0   :  { %v944_v9 = vpop.permute.xlu0 %943 }
 0xed1   :  { %v946_v11 = vpop.permute.xlu1 %945  ;;  %v949_v14 = vmul.f32 %v944_v9, %v914_v10 }
 0xed2   :  { %v950_v15 = vmul.f32 %v946_v11, %v929_v13 }
 0xed3   :  { %953 = vrot.lane.b32.xlu2 %v949_v14, %s2081_s3 }
 0xed4   :  { %955 = vrot.lane.b32.xlu0 %v950_v15, %s2081_s3 }
 0xf2d   :  { %v954_v19 = vpop.permute.xlu2 %953 }
 0xf2e   :  { %v2348_v20 = vadd.f32 %v954_v19, %v939_v18  ;;  %v175_v19 = vld [vmem:[#allocation9 + $0x18] sm:$0xff] }
 0xf2f   :  { %1111 = vmatpush.msrb.mxu3 %v175_v19  ;;  %1180 = vmatpush.msrb.mxu0 %v175_v19 }
 0xf30   :  { %1861 = vtanh.f32 %v2348_v20  ;;  %1247 = vmatpush.msrb.mxu1 %v175_v19  ;;  %1314 = vmatpush.msrb.mxu2 %v175_v19 }
 0xf36   :  { %v1862_v21 = vpop.eup %1861 }
 0xf37   :  { %965 = vrot.lane.b32.xlu1 %v1862_v21, %s2080_s4  ;;  %v174_v21 = vld [vmem:[#allocation9 + $0x10] sm:$0xff] }
 0xf38   :  { %1112 = vmatpush.msrb.mxu3 %v174_v21  ;;  %1181 = vmatpush.msrb.mxu0 %v174_v21 }
 0xf39   :  { %1248 = vmatpush.msrb.mxu1 %v174_v21  ;;  %1315 = vmatpush.msrb.mxu2 %v174_v21 }
 0xf3a   :  { %1113 = vmatpush.msrb.mxu3 %v173_v22  ;;  %1182 = vmatpush.msrb.mxu0 %v173_v22 }
 0xf3b   :  { %1249 = vmatpush.msrb.mxu1 %v173_v22  ;;  %1316 = vmatpush.msrb.mxu2 %v173_v22 }
 0xf46   :  { %v956_v24 = vpop.permute.xlu0 %955 }
 0xf47   :  { %v2353_v25 = vadd.f32 %v956_v24, %v940_v23  ;;  %v172_v23 = vld [vmem:[#allocation9] sm:$0xff] }
 0xf48   :  { %1114 = vmatpush.msrb.mxu3 %v172_v23  ;;  %1183 = vmatpush.msrb.mxu0 %v172_v23 }
 0xf49   :  { %1863 = vtanh.f32 %v2353_v25  ;;  %v1052_v7 = vrot.slane %v2353_v25, 7  ;;  %1250 = vmatpush.msrb.mxu1 %v172_v23  ;;  %1317 = vmatpush.msrb.mxu2 %v172_v23 }
 0xf4a   :  { %1381 = vmatpush.msra.mxu3 %v175_v19  ;;  %1448 = vmatpush.msra.mxu0 %v175_v19 }
 0xf4b   :  { %1515 = vmatpush.msra.mxu1 %v175_v19 }
 0xf4c   :  { %1382 = vmatpush.msra.mxu3 %v174_v21  ;;  %1449 = vmatpush.msra.mxu0 %v174_v21 }
 0xf4d   :  { %1516 = vmatpush.msra.mxu1 %v174_v21 }
 0xf4e   :  { %1383 = vmatpush.msra.mxu3 %v173_v22  ;;  %1450 = vmatpush.msra.mxu0 %v173_v22 }
 0xf4f   :  { %v1864_v26 = vpop.eup %1863  ;;  %1517 = vmatpush.msra.mxu1 %v173_v22 }
 0xf50   :  { %967 = vrot.lane.b32.xlu2 %v1864_v26, %s2080_s4  ;;  %1384 = vmatpush.msra.mxu3 %v172_v23 }
 0xf51   :  { %1451 = vmatpush.msra.mxu0 %v172_v23  ;;  %1518 = vmatpush.msra.mxu1 %v172_v23 }
 0xfa9   :  { %v966_v27 = vpop.permute.xlu1 %965 }
 0xfaa   :  { %v968_v28 = vpop.permute.xlu2 %967  ;;  %v971_v29 = vmul.f32 %v966_v27, %v914_v10 }
 0xfab   :  { %v972_v31 = vmul.f32 %v968_v28, %v929_v13  ;;  %v1051_v13 = vrot.slane %v2348_v20, 7 }
 0xfac   :  { %v975_v33 = vrot.slane %v971_v29, 6 }
 0xfad   :  { %v976_v34 = vrot.slane %v972_v31, 5 }
 0xfaf   :  { %v977_v32 = vsel %vm282_vm9, %v976_v34, %v975_v33  ;;  %v1751_v33 = vld [vmem:[%s2479_s7] ss:$0 sm:$0xff] }
 0xfb0   :  { %978 = vrot.lane.b32.xlu0 %v977_v32, %s2081_s3  ;;  %v2382_v34 = vadd.f32 %v1751_v33, %v2263_v3 }
 0xfb2   :  { %v1089_v32 = vperm.slane %v2382_v34, 0 }
0x1022   :  { %v979_v30 = vpop.permute.xlu0 %978 }
0x1023   :  { %1719 = vmatmul.msk.f32.vlgmr.msra.gmra.mxu2 %vm144_vm10, %v979_v30 }
0x1024   :  { %1582 = vmatpush.msra.mxu2 %v175_v19 }
0x1026   :  { %1583 = vmatpush.msra.mxu2 %v174_v21 }
0x1028   :  { %1584 = vmatpush.msra.mxu2 %v173_v22  ;;  %v1232_v22 = vperm.slane %v2382_v34, 2 }
0x102a   :  { %1585 = vmatpush.msra.mxu2 %v172_v23 }
0x10a6   :  { %v999_v35 = vpop.f32.mrf.mxu2 }
0x10a7   :  { %v1003_v36 = vrot.slane %v999_v35, 1  ;;  %v1004_v37 = vrot.slane %v999_v35, 2 }
0x10a9   :  { %v1007_v39 = vadd.f32 %v1003_v36, %v2217_v16  ;;  %v1008_v40 = vadd.f32 %v1004_v37, %v2214_v12 }
0x10ab   :  { %1865 = vtanh.f32 %v1007_v39  ;;  %v1721_v43 = vmul.f32 -1.442695, %v1008_v40  ;;  %v1720_v38 = vmul.f32 -1.442695, %v1007_v39 }
0x10ac   :  { %1867 = vtanh.f32 %v1008_v40 }
0x10ad   :  { %1869 = vpow2.f32 %v1721_v43 }
0x10b1   :  { %v1866_v41 = vpop.eup %1865 }
0x10b2   :  { %v1868_v42 = vpop.eup %1867  ;;  %1059 = vrot.lane.b32.xlu1 %v1866_v41, %s2080_s4 }
0x10b3   :  { %1061 = vrot.lane.b32.xlu2 %v1868_v42, %s2080_s4  ;;  %v1870_v44 = vpop.eup %1869 }
0x10b4   :  { %v1016_v45 = vadd.f32 1.0, %v1870_v44 }
0x10b6   :  { %1871 = vrcp.f32 %v1016_v45  ;;  %v1043_v46 = vand.u32 2147483648, %v1016_v45  ;;  %vm1037_vm6 = vweird.f32 %v1016_v45  ;;  %v1041_v49 = vand.u32 2147483647, %v1016_v45 }
0x10b7   :  { %1873 = vpow2.f32 %v1720_v38 }
0x10b8   :  { %v1044_v54 = vor.u32 1.1754944e-38, %v1043_v46  ;;  %vm1042_vm8 = vcmp.eq.f32.partialorder %v1041_v49, 8.507059e+37 }
0x10bc   :  { %v1872_v47 = vpop.eup %1871 }
0x10bd   :  { %v1033_v48 = vmul.f32 %v1872_v47, %v1016_v45  ;;  %v1874_v50 = vpop.eup %1873  ;;  %vm1038_vm5 = vweird.f32 %v1872_v47 }
0x10be   :  { %v1015_v53 = vadd.f32 1.0, %v1874_v50  ;;  %vm1039_vm7 = vmor %vm1037_vm6, %vm1038_vm5 }
0x10bf   :  { %v1034_v16 = vsub.f32 1.0, %v1033_v48 }
0x10c0   :  { %1875 = vrcp.f32 %v1015_v53  ;;  %v1028_v63 = vand.u32 2147483648, %v1015_v53  ;;  %vm1022_vm12 = vweird.f32 %v1015_v53  ;;  %v1026_v1 = vand.u32 2147483647, %v1015_v53 }
0x10c1   :  { %v1035_v12 = vmul.f32 %v1872_v47, %v1034_v16 }
0x10c2   :  { %v1029_v2 = vor.u32 1.1754944e-38, %v1028_v63  ;;  %vm1027_vm14 = vcmp.eq.f32.partialorder %v1026_v1, 8.507059e+37 }
0x10c3   :  { %v1036_v51 = vadd.f32 %v1872_v47, %v1035_v12 }
0x10c5   :  { %v1040_v52 = vsel %vm1039_vm7, %v1872_v47, %v1036_v51 }
0x10c6   :  { %v2364_v57 = vsel %vm1042_vm8, %v1044_v54, %v1040_v52  ;;  %v1876_v58 = vpop.eup %1875 }
0x10c7   :  { %v1018_v59 = vmul.f32 %v1876_v58, %v1015_v53  ;;  %vm1023_vm11 = vweird.f32 %v1876_v58  ;;  %v1056_v8 = vmul.f32 %v1052_v7, %v2364_v57 }
0x10c8   :  { %vm1024_vm13 = vmor %vm1022_vm12, %vm1023_vm11 }
0x10c9   :  { %v1019_v60 = vsub.f32 1.0, %v1018_v59 }
0x10cb   :  { %v1020_v61 = vmul.f32 %v1876_v58, %v1019_v60 }
0x10cd   :  { %v1021_v62 = vadd.f32 %v1876_v58, %v1020_v61 }
0x10cf   :  { %v1025_v0 = vsel %vm1024_vm13, %v1876_v58, %v1021_v62 }
0x10d0   :  { %v1030_v5 = vsel %vm1027_vm14, %v1029_v2, %v1025_v0 }
0x10d1   :  { %v1055_v14 = vmul.f32 %v1051_v13, %v1030_v5 }
0x110d   :  { %v1062_v55 = vpop.permute.xlu2 %1061 }
0x110e   :  { %v1066_v56 = vmul.f32 %v1062_v55, %v2364_v57 }
0x1110   :  { %1071 = vrot.lane.b32.xlu1 %v1066_v56, %s2081_s3 }
0x1124   :  { %v1060_v4 = vpop.permute.xlu1 %1059 }
0x1125   :  { %v1065_v6 = vmul.f32 %v1060_v4, %v1030_v5 }
0x1127   :  { %1069 = vrot.lane.b32.xlu0 %v1065_v6, %s2081_s3 }
0x1182   :  { %v1072_v9 = vpop.permute.xlu1 %1071 }
0x1183   :  { %v1076_v10 = vadd.f32 %v1072_v9, %v1056_v8 }
0x1185   :  { %1877 = vtanh.f32 %v1076_v10 }
0x118b   :  { %v1878_v11 = vpop.eup %1877 }
0x118c   :  { %1083 = vrot.lane.b32.xlu0 %v1878_v11, %s2080_s4 }
0x1199   :  { %v1070_v15 = vpop.permute.xlu0 %1069 }
0x119a   :  { %v1075_v17 = vadd.f32 %v1070_v15, %v1055_v14 }
0x119c   :  { %1879 = vtanh.f32 %v1075_v17 }
0x11a2   :  { %v1880_v18 = vpop.eup %1879 }
0x11a3   :  { %1081 = vrot.lane.b32.xlu2 %v1880_v18, %s2080_s4 }
0x11fd   :  { %v1082_v20 = vpop.permute.xlu2 %1081 }
0x11fe   :  { %v1084_v24 = vpop.permute.xlu0 %1083  ;;  %v1087_v25 = vmul.f32 %v1082_v20, %v1030_v5 }
0x11ff   :  { %v1088_v26 = vmul.f32 %v1084_v24, %v2364_v57  ;;  %v1165_v57 = vperm.slane %v2382_v34, 1 }
0x1200   :  { %v1092_v27 = vrot.slane %v1087_v25, 7 }
0x1201   :  { %v1093_v28 = vrot.slane %v1088_v26, 6 }
0x1203   :  { %v1094_v29 = vsel %vm282_vm9, %v1093_v28, %v1092_v27 }
0x1204   :  { %1095 = vrot.lane.b32.xlu1 %v1094_v29, %s2081_s3 }
0x1276   :  { %v1096_v31 = vpop.permute.xlu1 %1095 }
0x1277   :  { %1722 = vmatmul.msk.f32.vlgmr.msrb.gmra.mxu3 %vm144_vm10, %v1096_v31 }
0x12fa   :  { %v1116_v30 = vpop.f32.mrf.mxu3 }
0x12fb   :  { %v1119_v35 = vadd.f32 %v1116_v30, %v1089_v32 }
0x12fd   :  { %1881 = vtanh.f32 %v1119_v35  ;;  %v1723_v37 = vmul.f32 -1.442695, %v1119_v35 }
0x12ff   :  { %1883 = vpow2.f32 %v1723_v37 }
0x1303   :  { %v1882_v36 = vpop.eup %1881 }
0x1304   :  { %1142 = vrot.lane.b32.xlu2 %v1882_v36, %s2080_s4 }
0x1305   :  { %v1884_v39 = vpop.eup %1883 }
0x1306   :  { %v1123_v40 = vadd.f32 1.0, %v1884_v39 }
0x1308   :  { %1885 = vrcp.f32 %v1123_v40  ;;  %v1135_v3 = vand.u32 2147483648, %v1123_v40  ;;  %vm1129_vm15 = vweird.f32 %v1123_v40  ;;  %v1133_v47 = vand.u32 2147483647, %v1123_v40 }
0x130a   :  { %v1136_v48 = vor.u32 1.1754944e-38, %v1135_v3  ;;  %vm1134_vm2 = vcmp.eq.f32.partialorder %v1133_v47, 8.507059e+37 }
0x130e   :  { %v1886_v41 = vpop.eup %1885 }
0x130f   :  { %v1125_v42 = vmul.f32 %v1886_v41, %v1123_v40  ;;  %vm1130_vm9 = vweird.f32 %v1886_v41 }
0x1310   :  { %vm1131_vm1 = vmor %vm1129_vm15, %vm1130_vm9 }
0x1311   :  { %v1126_v43 = vsub.f32 1.0, %v1125_v42 }
0x1313   :  { %v1127_v44 = vmul.f32 %v1886_v41, %v1126_v43 }
0x1315   :  { %v1128_v45 = vadd.f32 %v1886_v41, %v1127_v44 }
0x1317   :  { %v1132_v38 = vsel %vm1131_vm1, %v1886_v41, %v1128_v45 }
0x1318   :  { %v1137_v50 = vsel %vm1134_vm2, %v1136_v48, %v1132_v38  ;;  %v1299_v48 = vperm.slane %v2382_v34, 3 }
0x1319   :  { %v1140_v53 = vmul.f32 0.0, %v1137_v50 }
0x135e   :  { %v1143_v16 = vpop.permute.xlu2 %1142 }
0x135f   :  { %v1145_v12 = vmul.f32 %v1143_v16, %v1137_v50 }
0x1361   :  { %1147 = vrot.lane.b32.xlu0 %v1145_v12, %s2081_s3 }
0x13d3   :  { %v1148_v51 = vpop.permute.xlu0 %1147 }
0x13d4   :  { %v1150_v46 = vadd.f32 %v1148_v51, %v1140_v53 }
0x13d6   :  { %1887 = vtanh.f32 %v1150_v46 }
0x13dc   :  { %v1888_v49 = vpop.eup %1887 }
0x13dd   :  { %1153 = vrot.lane.b32.xlu1 %v1888_v49, %s2080_s4 }
0x144f   :  { %v1154_v52 = vpop.permute.xlu1 %1153 }
0x1450   :  { %v1156_v54 = vmul.f32 %v1154_v52, %v1137_v50 }
0x1452   :  { %1158 = vrot.lane.b32.xlu2 %v1156_v54, %s2081_s3 }
0x14ac   :  { %v1159_v55 = vpop.permute.xlu2 %1158 }
0x14ad   :  { %1162 = vst.msk [vmem:[#allocation2] sm:$0x1] %vm1161_vm3, %v1159_v55  ;;  %1724 = vmatmul.msk.f32.vlgmr.msrb.gmra.mxu0 %vm144_vm10, %v1159_v55 }
0x14ae   :  { %1164 = vst.msk [vmem:[#allocation2 + $0x7] sm:$0x2] %vm1163_vm4, %v1159_v55 }
0x152a   :  { %v1185_v58 = vpop.f32.mrf.mxu0 }
0x152b   :  { %v1188_v56 = vadd.f32 %v1185_v58, %v1165_v57 }
0x152d   :  { %1889 = vtanh.f32 %v1188_v56  ;;  %v1725_v60 = vmul.f32 -1.442695, %v1188_v56 }
0x152f   :  { %1891 = vpow2.f32 %v1725_v60 }
0x1533   :  { %v1890_v59 = vpop.eup %1889 }
0x1534   :  { %1211 = vrot.lane.b32.xlu0 %v1890_v59, %s2080_s4 }
0x1535   :  { %v1892_v61 = vpop.eup %1891 }
0x1536   :  { %v1192_v62 = vadd.f32 1.0, %v1892_v61 }
0x1538   :  { %1893 = vrcp.f32 %v1192_v62  ;;  %v1204_v5 = vand.u32 2147483648, %v1192_v62  ;;  %vm1198_vm6 = vweird.f32 %v1192_v62  ;;  %v1202_v6 = vand.u32 2147483647, %v1192_v62 }
0x153a   :  { %v1205_v8 = vor.u32 1.1754944e-38, %v1204_v5  ;;  %vm1203_vm8 = vcmp.eq.f32.partialorder %v1202_v6, 8.507059e+37 }
0x153e   :  { %v1894_v63 = vpop.eup %1893 }
0x153f   :  { %v1194_v1 = vmul.f32 %v1894_v63, %v1192_v62  ;;  %vm1199_vm5 = vweird.f32 %v1894_v63 }
0x1540   :  { %vm1200_vm7 = vmor %vm1198_vm6, %vm1199_vm5 }
0x1541   :  { %v1195_v0 = vsub.f32 1.0, %v1194_v1 }
0x1543   :  { %v1196_v2 = vmul.f32 %v1894_v63, %v1195_v0 }
0x1545   :  { %v1197_v4 = vadd.f32 %v1894_v63, %v1196_v2 }
0x1547   :  { %v1201_v7 = vsel %vm1200_vm7, %v1894_v63, %v1197_v4 }
0x1548   :  { %v1206_v10 = vsel %vm1203_vm8, %v1205_v8, %v1201_v7  ;;  %v1366_v8 = vperm.slane %v2382_v34, 4 }
0x1549   :  { %v1209_v13 = vmul.f32 %v1206_v10, %v1150_v46 }
0x15a6   :  { %v1212_v9 = vpop.permute.xlu0 %1211 }
0x15a7   :  { %v1214_v11 = vmul.f32 %v1212_v9, %v1206_v10 }
0x15a9   :  { %1216 = vrot.lane.b32.xlu1 %v1214_v11, %s2081_s3 }
0x161b   :  { %v1217_v14 = vpop.permute.xlu1 %1216 }
0x161c   :  { %v1219_v15 = vadd.f32 %v1217_v14, %v1209_v13 }
0x161e   :  { %1895 = vtanh.f32 %v1219_v15 }
0x1624   :  { %v1896_v17 = vpop.eup %1895 }
0x1625   :  { %1222 = vrot.lane.b32.xlu2 %v1896_v17, %s2080_s4 }
0x167f   :  { %v1223_v18 = vpop.permute.xlu2 %1222 }
0x1680   :  { %v1225_v19 = vmul.f32 %v1223_v18, %v1206_v10 }
0x1682   :  { %1227 = vrot.lane.b32.xlu0 %v1225_v19, %s2081_s3 }
0x16f4   :  { %v1228_v21 = vpop.permute.xlu0 %1227 }
0x16f5   :  { %1230 = vst.msk [vmem:[#allocation2 + $0x1] sm:$0x1] %vm1161_vm3, %v1228_v21  ;;  %1726 = vmatmul.msk.f32.vlgmr.msrb.gmra.mxu1 %vm144_vm10, %v1228_v21 }
0x16f6   :  { %1231 = vst.msk [vmem:[#allocation2 + $0x8] sm:$0x2] %vm1163_vm4, %v1228_v21 }
0x1772   :  { %v1252_v23 = vpop.f32.mrf.mxu1 }
0x1773   :  { %v1255_v20 = vadd.f32 %v1252_v23, %v1232_v22 }
0x1775   :  { %1897 = vtanh.f32 %v1255_v20  ;;  %v1727_v25 = vmul.f32 -1.442695, %v1255_v20 }
0x1777   :  { %1899 = vpow2.f32 %v1727_v25 }
0x177b   :  { %v1898_v24 = vpop.eup %1897 }
0x177c   :  { %1278 = vrot.lane.b32.xlu1 %v1898_v24, %s2080_s4 }
0x177d   :  { %v1900_v26 = vpop.eup %1899 }
0x177e   :  { %v1259_v27 = vadd.f32 1.0, %v1900_v26 }
0x1780   :  { %1901 = vrcp.f32 %v1259_v27  ;;  %v1271_v30 = vand.u32 2147483648, %v1259_v27  ;;  %vm1265_vm12 = vweird.f32 %v1259_v27  ;;  %v1269_v35 = vand.u32 2147483647, %v1259_v27 }
0x1782   :  { %v1272_v37 = vor.u32 1.1754944e-38, %v1271_v30  ;;  %vm1270_vm14 = vcmp.eq.f32.partialorder %v1269_v35, 8.507059e+37 }
0x1786   :  { %v1902_v28 = vpop.eup %1901 }
0x1787   :  { %v1261_v29 = vmul.f32 %v1902_v28, %v1259_v27  ;;  %vm1266_vm11 = vweird.f32 %v1902_v28 }
0x1788   :  { %vm1267_vm13 = vmor %vm1265_vm12, %vm1266_vm11 }
0x1789   :  { %v1262_v31 = vsub.f32 1.0, %v1261_v29 }
0x178b   :  { %v1263_v33 = vmul.f32 %v1902_v28, %v1262_v31 }
0x178d   :  { %v1264_v32 = vadd.f32 %v1902_v28, %v1263_v33 }
0x178f   :  { %v1268_v36 = vsel %vm1267_vm13, %v1902_v28, %v1264_v32 }
0x1790   :  { %v1273_v40 = vsel %vm1270_vm14, %v1272_v37, %v1268_v36  ;;  %v1433_v37 = vperm.slane %v2382_v34, 5 }
0x1791   :  { %v1276_v42 = vmul.f32 %v1273_v40, %v1219_v15 }
0x17ee   :  { %v1279_v39 = vpop.permute.xlu1 %1278 }
0x17ef   :  { %v1281_v41 = vmul.f32 %v1279_v39, %v1273_v40 }
0x17f1   :  { %1283 = vrot.lane.b32.xlu2 %v1281_v41, %s2081_s3 }
0x184b   :  { %v1284_v43 = vpop.permute.xlu2 %1283 }
0x184c   :  { %v1286_v44 = vadd.f32 %v1284_v43, %v1276_v42 }
0x184e   :  { %1903 = vtanh.f32 %v1286_v44 }
0x1854   :  { %v1904_v45 = vpop.eup %1903 }
0x1855   :  { %1289 = vrot.lane.b32.xlu0 %v1904_v45, %s2080_s4 }
0x18c7   :  { %v1290_v3 = vpop.permute.xlu0 %1289 }
0x18c8   :  { %v1292_v47 = vmul.f32 %v1290_v3, %v1273_v40 }
0x18ca   :  { %1294 = vrot.lane.b32.xlu1 %v1292_v47, %s2081_s3 }
0x193c   :  { %v1295_v38 = vpop.permute.xlu1 %1294 }
0x193d   :  { %1297 = vst.msk [vmem:[#allocation2 + $0x2] sm:$0x1] %vm1161_vm3, %v1295_v38  ;;  %1728 = vmatmul.msk.f32.vlgmr.msrb.gmra.mxu2 %vm144_vm10, %v1295_v38 }
0x193e   :  { %1298 = vst.msk [vmem:[#allocation2 + $0x9] sm:$0x2] %vm1163_vm4, %v1295_v38 }
0x19c0   :  { %v1319_v16 = vpop.f32.mrf.mxu2 }
0x19c1   :  { %v1322_v50 = vadd.f32 %v1319_v16, %v1299_v48 }
0x19c3   :  { %1905 = vtanh.f32 %v1322_v50  ;;  %v1729_v53 = vmul.f32 -1.442695, %v1322_v50 }
0x19c5   :  { %1907 = vpow2.f32 %v1729_v53 }
0x19c9   :  { %v1906_v12 = vpop.eup %1905 }
0x19ca   :  { %1345 = vrot.lane.b32.xlu2 %v1906_v12, %s2080_s4 }
0x19cb   :  { %v1908_v51 = vpop.eup %1907 }
0x19cc   :  { %v1326_v46 = vadd.f32 1.0, %v1908_v51 }
0x19ce   :  { %1909 = vrcp.f32 %v1326_v46  ;;  %v1338_v58 = vand.u32 2147483648, %v1326_v46  ;;  %vm1332_vm15 = vweird.f32 %v1326_v46  ;;  %v1336_v56 = vand.u32 2147483647, %v1326_v46 }
0x19d0   :  { %v1339_v60 = vor.u32 1.1754944e-38, %v1338_v58  ;;  %vm1337_vm2 = vcmp.eq.f32.partialorder %v1336_v56, 8.507059e+37 }
0x19d4   :  { %v1910_v49 = vpop.eup %1909 }
0x19d5   :  { %v1328_v52 = vmul.f32 %v1910_v49, %v1326_v46  ;;  %vm1333_vm9 = vweird.f32 %v1910_v49 }
0x19d6   :  { %vm1334_vm1 = vmor %vm1332_vm15, %vm1333_vm9 }
0x19d7   :  { %v1329_v54 = vsub.f32 1.0, %v1328_v52 }
0x19d9   :  { %v1330_v55 = vmul.f32 %v1910_v49, %v1329_v54 }
0x19db   :  { %v1331_v57 = vadd.f32 %v1910_v49, %v1330_v55 }
0x19dd   :  { %v1335_v59 = vsel %vm1334_vm1, %v1910_v49, %v1331_v57 }
0x19de   :  { %v1340_v62 = vsel %vm1337_vm2, %v1339_v60, %v1335_v59  ;;  %v1500_v60 = vperm.slane %v2382_v34, 6 }
0x19df   :  { %v1343_v1 = vmul.f32 %v1340_v62, %v1286_v44 }
0x1a24   :  { %v1346_v61 = vpop.permute.xlu2 %1345 }
0x1a25   :  { %v1348_v63 = vmul.f32 %v1346_v61, %v1340_v62 }
0x1a27   :  { %1350 = vrot.lane.b32.xlu0 %v1348_v63, %s2081_s3 }
0x1a99   :  { %v1351_v0 = vpop.permute.xlu0 %1350 }
0x1a9a   :  { %v1353_v2 = vadd.f32 %v1351_v0, %v1343_v1 }
0x1a9c   :  { %1911 = vtanh.f32 %v1353_v2 }
0x1aa2   :  { %v1912_v4 = vpop.eup %1911 }
0x1aa3   :  { %1356 = vrot.lane.b32.xlu1 %v1912_v4, %s2080_s4 }
0x1b15   :  { %v1357_v5 = vpop.permute.xlu1 %1356 }
0x1b16   :  { %v1359_v6 = vmul.f32 %v1357_v5, %v1340_v62 }
0x1b18   :  { %1361 = vrot.lane.b32.xlu2 %v1359_v6, %s2081_s3 }
0x1b72   :  { %v1362_v7 = vpop.permute.xlu2 %1361 }
0x1b73   :  { %1364 = vst.msk [vmem:[#allocation2 + $0x3] sm:$0x1] %vm1161_vm3, %v1362_v7  ;;  %1730 = vmatmul.msk.f32.vlgmr.msra.gmra.mxu3 %vm144_vm10, %v1362_v7 }
0x1b74   :  { %1365 = vst.msk [vmem:[#allocation2 + $0xa] sm:$0x2] %vm1163_vm4, %v1362_v7 }
0x1bf6   :  { %v1386_v9 = vpop.f32.mrf.mxu3 }
0x1bf7   :  { %v1389_v10 = vadd.f32 %v1386_v9, %v1366_v8 }
0x1bf9   :  { %1913 = vtanh.f32 %v1389_v10  ;;  %v1731_v13 = vmul.f32 -1.442695, %v1389_v10 }
0x1bfb   :  { %1915 = vpow2.f32 %v1731_v13 }
0x1bff   :  { %v1914_v11 = vpop.eup %1913 }
0x1c00   :  { %1412 = vrot.lane.b32.xlu0 %v1914_v11, %s2080_s4 }
0x1c01   :  { %v1916_v14 = vpop.eup %1915 }
0x1c02   :  { %v1393_v15 = vadd.f32 1.0, %v1916_v14 }
0x1c04   :  { %1917 = vrcp.f32 %v1393_v15  ;;  %v1405_v23 = vand.u32 2147483648, %v1393_v15  ;;  %vm1399_vm6 = vweird.f32 %v1393_v15  ;;  %v1403_v20 = vand.u32 2147483647, %v1393_v15 }
0x1c06   :  { %v1406_v25 = vor.u32 1.1754944e-38, %v1405_v23  ;;  %vm1404_vm8 = vcmp.eq.f32.partialorder %v1403_v20, 8.507059e+37 }
0x1c0a   :  { %v1918_v17 = vpop.eup %1917 }
0x1c0b   :  { %v1395_v18 = vmul.f32 %v1918_v17, %v1393_v15  ;;  %vm1400_vm5 = vweird.f32 %v1918_v17 }
0x1c0c   :  { %vm1401_vm7 = vmor %vm1399_vm6, %vm1400_vm5 }
0x1c0d   :  { %v1396_v19 = vsub.f32 1.0, %v1395_v18 }
0x1c0f   :  { %v1397_v21 = vmul.f32 %v1918_v17, %v1396_v19 }
0x1c11   :  { %v1398_v22 = vadd.f32 %v1918_v17, %v1397_v21 }
0x1c13   :  { %v1402_v24 = vsel %vm1401_vm7, %v1918_v17, %v1398_v22 }
0x1c14   :  { %v1407_v27 = vsel %vm1404_vm8, %v1406_v25, %v1402_v24  ;;  %v1567_v25 = vperm.slane %v2382_v34, 7 }
0x1c15   :  { %v1410_v29 = vmul.f32 %v1407_v27, %v1353_v2 }
0x1c72   :  { %v1413_v26 = vpop.permute.xlu0 %1412 }
0x1c73   :  { %v1415_v28 = vmul.f32 %v1413_v26, %v1407_v27 }
0x1c75   :  { %1417 = vrot.lane.b32.xlu1 %v1415_v28, %s2081_s3 }
0x1ce7   :  { %v1418_v31 = vpop.permute.xlu1 %1417 }
0x1ce8   :  { %v1420_v33 = vadd.f32 %v1418_v31, %v1410_v29 }
0x1cea   :  { %1919 = vtanh.f32 %v1420_v33 }
0x1cf0   :  { %v1920_v32 = vpop.eup %1919 }
0x1cf1   :  { %1423 = vrot.lane.b32.xlu2 %v1920_v32, %s2080_s4 }
0x1d4b   :  { %v1424_v30 = vpop.permute.xlu2 %1423 }
0x1d4c   :  { %v1426_v35 = vmul.f32 %v1424_v30, %v1407_v27 }
0x1d4e   :  { %1428 = vrot.lane.b32.xlu0 %v1426_v35, %s2081_s3 }
0x1dc0   :  { %v1429_v36 = vpop.permute.xlu0 %1428 }
0x1dc1   :  { %1431 = vst.msk [vmem:[#allocation2 + $0x4] sm:$0x1] %vm1161_vm3, %v1429_v36  ;;  %1732 = vmatmul.msk.f32.vlgmr.msra.gmra.mxu0 %vm144_vm10, %v1429_v36 }
0x1dc2   :  { %1432 = vst.msk [vmem:[#allocation2 + $0xb] sm:$0x2] %vm1163_vm4, %v1429_v36 }
0x1e3e   :  { %v1453_v39 = vpop.f32.mrf.mxu0 }
0x1e3f   :  { %v1456_v40 = vadd.f32 %v1453_v39, %v1433_v37 }
0x1e41   :  { %1921 = vtanh.f32 %v1456_v40  ;;  %v1733_v42 = vmul.f32 -1.442695, %v1456_v40 }
0x1e43   :  { %1923 = vpow2.f32 %v1733_v42 }
0x1e47   :  { %v1922_v41 = vpop.eup %1921 }
0x1e48   :  { %1479 = vrot.lane.b32.xlu1 %v1922_v41, %s2080_s4 }
0x1e49   :  { %v1924_v43 = vpop.eup %1923 }
0x1e4a   :  { %v1460_v44 = vadd.f32 1.0, %v1924_v43 }
0x1e4c   :  { %1925 = vrcp.f32 %v1460_v44  ;;  %v1472_v16 = vand.u32 2147483648, %v1460_v44  ;;  %vm1466_vm12 = vweird.f32 %v1460_v44  ;;  %v1470_v50 = vand.u32 2147483647, %v1460_v44 }
0x1e4e   :  { %v1473_v53 = vor.u32 1.1754944e-38, %v1472_v16  ;;  %vm1471_vm14 = vcmp.eq.f32.partialorder %v1470_v50, 8.507059e+37  ;;  %v1639_v50 = vld [vmem:[%s2480_s8 + $0x18] sm:$0xff] }
0x1e4f   :  { %1662 = vmatpush.msrb.mxu3 %v1639_v50 }
0x1e52   :  { %v1926_v45 = vpop.eup %1925 }
0x1e53   :  { %v1462_v3 = vmul.f32 %v1926_v45, %v1460_v44  ;;  %vm1467_vm11 = vweird.f32 %v1926_v45 }
0x1e54   :  { %vm1468_vm13 = vmor %vm1466_vm12, %vm1467_vm11 }
0x1e55   :  { %v1463_v47 = vsub.f32 1.0, %v1462_v3 }
0x1e57   :  { %v1464_v38 = vmul.f32 %v1926_v45, %v1463_v47 }
0x1e59   :  { %v1465_v48 = vadd.f32 %v1926_v45, %v1464_v38 }
0x1e5b   :  { %v1469_v12 = vsel %vm1468_vm13, %v1926_v45, %v1465_v48 }
0x1e5c   :  { %v1474_v46 = vsel %vm1471_vm14, %v1473_v53, %v1469_v12  ;;  %v1638_v12 = vld [vmem:[%s2480_s8 + $0x10] sm:$0xff]  ;;  %v1637_v53 = vld [vmem:[%s2480_s8 + $0x8] sm:$0xff] }
0x1e5d   :  { %v1477_v52 = vmul.f32 %v1474_v46, %v1420_v33  ;;  %1663 = vmatpush.msrb.mxu3 %v1638_v12 }
0x1e5f   :  { %1664 = vmatpush.msrb.mxu3 %v1637_v53 }
0x1eba   :  { %v1480_v51 = vpop.permute.xlu1 %1479 }
0x1ebb   :  { %v1482_v49 = vmul.f32 %v1480_v51, %v1474_v46  ;;  %v1636_v51 = vld [vmem:[%s2480_s8] sm:$0xff]  ;;  %s2082_s8 = smov [#allocation11]  }
0x1ebc   :  { %1665 = vmatpush.msrb.mxu3 %v1636_v51  ;;  %s1679_s13 = sshll.u32 %s2082_s8, 4  ;;  %s1680_s13 = int_to_ptr.vmem [resolvable:$true] %s1679_s13 }
0x1ebd   :  { %1484 = vrot.lane.b32.xlu2 %v1482_v49, %s2081_s3 }
0x1f17   :  { %v1485_v54 = vpop.permute.xlu2 %1484 }
0x1f18   :  { %v1487_v55 = vadd.f32 %v1485_v54, %v1477_v52  ;;  %v1752_v54 = vld [vmem:[%s2481_s9] ss:$0 sm:$0xff] }
0x1f1a   :  { %1927 = vtanh.f32 %v1487_v55 }
0x1f20   :  { %v1928_v57 = vpop.eup %1927 }
0x1f21   :  { %1490 = vrot.lane.b32.xlu0 %v1928_v57, %s2080_s4 }
0x1f93   :  { %v1491_v58 = vpop.permute.xlu0 %1490 }
0x1f94   :  { %v1493_v56 = vmul.f32 %v1491_v58, %v1474_v46 }
0x1f96   :  { %1495 = vrot.lane.b32.xlu1 %v1493_v56, %s2081_s3 }
0x2008   :  { %v1496_v59 = vpop.permute.xlu1 %1495 }
0x2009   :  { %1498 = vst.msk [vmem:[#allocation2 + $0x5] sm:$0x1] %vm1161_vm3, %v1496_v59  ;;  %1734 = vmatmul.msk.f32.vlgmr.msra.gmra.mxu1 %vm144_vm10, %v1496_v59 }
0x200a   :  { %1499 = vst.msk [vmem:[#allocation2 + $0xc] sm:$0x2] %vm1163_vm4, %v1496_v59 }
0x2086   :  { %v1520_v61 = vpop.f32.mrf.mxu1 }
0x2087   :  { %v1523_v62 = vadd.f32 %v1520_v61, %v1500_v60 }
0x2089   :  { %1929 = vtanh.f32 %v1523_v62  ;;  %v1735_v1 = vmul.f32 -1.442695, %v1523_v62 }
0x208b   :  { %1931 = vpow2.f32 %v1735_v1 }
0x208f   :  { %v1930_v63 = vpop.eup %1929 }
0x2090   :  { %1546 = vrot.lane.b32.xlu2 %v1930_v63, %s2080_s4 }
0x2091   :  { %v1932_v0 = vpop.eup %1931 }
0x2092   :  { %v1527_v2 = vadd.f32 1.0, %v1932_v0 }
0x2094   :  { %1933 = vrcp.f32 %v1527_v2  ;;  %v1539_v9 = vand.u32 2147483648, %v1527_v2  ;;  %vm1533_vm15 = vweird.f32 %v1527_v2  ;;  %v1537_v10 = vand.u32 2147483647, %v1527_v2 }
0x2096   :  { %v1540_v13 = vor.u32 1.1754944e-38, %v1539_v9  ;;  %vm1538_vm2 = vcmp.eq.f32.partialorder %v1537_v10, 8.507059e+37 }
0x209a   :  { %v1934_v4 = vpop.eup %1933 }
0x209b   :  { %v1529_v5 = vmul.f32 %v1934_v4, %v1527_v2  ;;  %vm1534_vm9 = vweird.f32 %v1934_v4 }
0x209c   :  { %vm1535_vm1 = vmor %vm1533_vm15, %vm1534_vm9 }
0x209d   :  { %v1530_v6 = vsub.f32 1.0, %v1529_v5 }
0x209f   :  { %v1531_v7 = vmul.f32 %v1934_v4, %v1530_v6 }
0x20a1   :  { %v1532_v8 = vadd.f32 %v1934_v4, %v1531_v7 }
0x20a3   :  { %v1536_v11 = vsel %vm1535_vm1, %v1934_v4, %v1532_v8 }
0x20a4   :  { %v1541_v15 = vsel %vm1538_vm2, %v1540_v13, %v1536_v11 }
0x20a5   :  { %v1544_v18 = vmul.f32 %v1541_v15, %v1487_v55 }
0x20ea   :  { %v1547_v14 = vpop.permute.xlu2 %1546 }
0x20eb   :  { %v1549_v17 = vmul.f32 %v1547_v14, %v1541_v15 }
0x20ed   :  { %1551 = vrot.lane.b32.xlu0 %v1549_v17, %s2081_s3 }
0x215f   :  { %v1552_v19 = vpop.permute.xlu0 %1551 }
0x2160   :  { %v1554_v21 = vadd.f32 %v1552_v19, %v1544_v18 }
0x2162   :  { %1935 = vtanh.f32 %v1554_v21 }
0x2168   :  { %v1936_v22 = vpop.eup %1935 }
0x2169   :  { %1557 = vrot.lane.b32.xlu1 %v1936_v22, %s2080_s4 }
0x21db   :  { %v1558_v23 = vpop.permute.xlu1 %1557 }
0x21dc   :  { %v1560_v20 = vmul.f32 %v1558_v23, %v1541_v15 }
0x21de   :  { %1562 = vrot.lane.b32.xlu2 %v1560_v20, %s2081_s3 }
0x2238   :  { %v1563_v24 = vpop.permute.xlu2 %1562 }
0x2239   :  { %1565 = vst.msk [vmem:[#allocation2 + $0x6] sm:$0x1] %vm1161_vm3, %v1563_v24  ;;  %1736 = vmatmul.msk.f32.vlgmr.msra.gmra.mxu2 %vm144_vm10, %v1563_v24 }
0x223a   :  { %1566 = vst.msk [vmem:[#allocation2 + $0xd] sm:$0x2] %vm1163_vm4, %v1563_v24 }
0x22bc   :  { %v1587_v26 = vpop.f32.mrf.mxu2 }
0x22bd   :  { %v1590_v27 = vadd.f32 %v1587_v26, %v1567_v25 }
0x22bf   :  { %1937 = vtanh.f32 %v1590_v27  ;;  %v1737_v29 = vmul.f32 -1.442695, %v1590_v27 }
0x22c1   :  { %1939 = vpow2.f32 %v1737_v29 }
0x22c5   :  { %v1938_v28 = vpop.eup %1937 }
0x22c6   :  { %1613 = vrot.lane.b32.xlu0 %v1938_v28, %s2080_s4 }
0x22c7   :  { %v1940_v31 = vpop.eup %1939 }
0x22c8   :  { %v1594_v33 = vadd.f32 1.0, %v1940_v31 }
0x22ca   :  { %1941 = vrcp.f32 %v1594_v33  ;;  %v1606_v39 = vand.u32 2147483648, %v1594_v33  ;;  %vm1600_vm6 = vweird.f32 %v1594_v33  ;;  %v1604_v34 = vand.u32 2147483647, %v1594_v33 }
0x22cc   :  { %v1607_v41 = vor.u32 1.1754944e-38, %v1606_v39  ;;  %vm1605_vm8 = vcmp.eq.f32.partialorder %v1604_v34, 8.507059e+37 }
0x22d0   :  { %v1942_v32 = vpop.eup %1941 }
0x22d1   :  { %v1596_v30 = vmul.f32 %v1942_v32, %v1594_v33  ;;  %vm1601_vm5 = vweird.f32 %v1942_v32 }
0x22d2   :  { %vm1602_vm7 = vmor %vm1600_vm6, %vm1601_vm5 }
0x22d3   :  { %v1597_v35 = vsub.f32 1.0, %v1596_v30 }
0x22d5   :  { %v1598_v36 = vmul.f32 %v1942_v32, %v1597_v35 }
0x22d7   :  { %v1599_v37 = vadd.f32 %v1942_v32, %v1598_v36 }
0x22d9   :  { %v1603_v40 = vsel %vm1602_vm7, %v1942_v32, %v1599_v37 }
0x22da   :  { %v1608_v43 = vsel %vm1605_vm8, %v1607_v41, %v1603_v40 }
0x22db   :  { %v1611_v45 = vmul.f32 %v1608_v43, %v1554_v21 }
0x2338   :  { %v1614_v42 = vpop.permute.xlu0 %1613 }
0x2339   :  { %v1616_v44 = vmul.f32 %v1614_v42, %v1608_v43 }
0x233b   :  { %1618 = vrot.lane.b32.xlu1 %v1616_v44, %s2081_s3 }
0x23ad   :  { %v1619_v3 = vpop.permute.xlu1 %1618 }
0x23ae   :  { %v1621_v47 = vadd.f32 %v1619_v3, %v1611_v45 }
0x23b0   :  { %1943 = vtanh.f32 %v1621_v47 }
0x23b6   :  { %v1944_v38 = vpop.eup %1943 }
0x23b7   :  { %1624 = vrot.lane.b32.xlu2 %v1944_v38, %s2080_s4 }
0x2411   :  { %v1625_v48 = vpop.permute.xlu2 %1624 }
0x2412   :  { %v1627_v16 = vmul.f32 %v1625_v48, %v1608_v43 }
0x2414   :  { %1629 = vrot.lane.b32.xlu0 %v1627_v16, %s2081_s3 }
0x2486   :  { %v1630_v46 = vpop.permute.xlu0 %1629 }
0x2487   :  { %1632 = vst.msk [vmem:[#allocation2 + $0x7] sm:$0x1] %vm1161_vm3, %v1630_v46 }
0x2488   :  { %1633 = vst.msk [vmem:[#allocation2 + $0xe] sm:$0x2] %vm1163_vm4, %v1630_v46 }
0x248e   :  { %v1634_v49 = vld [vmem:[#allocation2] sm:$0xff] }
0x248f   :  { %1738 = vmatmul.msk.f32.vlgmr.msrb.gmra.mxu3 %vm144_vm10, %v1634_v49  ;;  %v1635_v52 = vld [vmem:[#allocation2 + $0x8] sm:$0xff] }
0x2497   :  { %1739 = vmatmul.msk.f32.gmra.mxu3 %vm144_vm10, %v1635_v52 }
0x2512   :  { %v1667_v55 = vpop.f32.mrf.mxu3 }
0x2513   :  { %v1668_v57 = vadd.f32 %v1752_v54, %v1667_v55 }
0x2515   :  { %1673 = vst.msk [vmem:[#allocation11] sm:$0xff] %vm105_vm0, %v1668_v57 }
0x251a   :  { %v1670_v58 = vpop.f32.mrf.mxu3 }
0x251b   :  { %v1671_v56 = vadd.f32 %v1752_v54, %v1670_v58 }
0x251d   :  { %1674 = vst.msk [vmem:[#allocation11 + $0x8] sm:$0xff] %vm105_vm0, %v1671_v56 }
0x251e   :  { %1687 = dma.vmem_to_hbm [thread:$0]  %s1680_s13, 256, %s1682_s16, [#allocation5], %s2075_s23, %s2075_s23, %s2076_s24  }
0x251f   :  { %2071 = dma.done.wait [#allocation5], 256  }
0x2520   :  { %2072 = vsyncadd [#allocation5], 4294967040 }
0x2521   :  { %1692 = vsyncpa [#allocation4], 1 }
0x2522   :  { %1693 = vsyncpa [#allocation7], 1 }
0x2523   :  { %1694 = vsyncpa [#allocation10], 1 }
0x2524   :  { %1695 = vsyncpa [#allocation5], 1 }

</bundles_post_ra>
